<compile_context>
chip_gen: v7x
topology: tpu7x:2x2x1
jax: 0.10.0
libtpu: 0.0.40
codegen_flags: <defaults>
</compile_context>

<pallas_src>
import numpy as np
import jax
import jax.numpy as jnp
from jax.experimental import pallas as pl
from jax.experimental.pallas import tpu as pltpu

# ----------------------------- static geometry ------------------------------
CIN, C1, C2, NCLS = 1, 8, 16, 10
H1 = W1 = 28                       # conv1 spatial
WP1 = W1 + 2                       # padded row stride (30)
P1 = (H1 + 2) * (W1 + 2)           # 900: padded-flat conv1 input length
G1 = (H1 - 1) * WP1 + W1           # 838: flat length of conv1 output (gappy rows)
L1 = 2 * (H1 // 2 - 1) * WP1 + 2 * (W1 // 2 - 1) + 1   # 807 pool1 window bases

H2 = W2 = 14                       # conv2 spatial
WP2 = W2 + 2                       # 16
P2 = (H2 + 2) * (W2 + 2)           # 256: padded-flat conv2 input length
G2 = (H2 - 1) * WP2 + W2           # 222
L2 = 2 * (H2 // 2 - 1) * WP2 + 2 * (W2 // 2 - 1) + 1   # 205 pool2 window bases
T2 = (H2 // 2) * (W2 // 2)         # 49 pooled features per channel


def _pool_selection(H, W, pad_out):
    """0/1 matrix (L, T): picks the top-left index of each 2x2 pool window out
    of the gappy conv-output layout (row stride W+2) and lays the pooled map
    out either zero-padded (H/2+2)x(W/2+2) for the next conv, or densely."""
    Wp = W + 2
    Ho, Wo = H // 2, W // 2
    L = 2 * (Ho - 1) * Wp + 2 * (Wo - 1) + 1
    T = (Ho + 2) * (Wo + 2) if pad_out else Ho * Wo
    sel = np.zeros((L, T), np.float32)
    for ho in range(Ho):
        for wo in range(Wo):
            g = 2 * ho * Wp + 2 * wo
            t = (ho + 1) * (Wo + 2) + (wo + 1) if pad_out else ho * Wo + wo
            sel[g, t] = 1.0
    return sel


_SEL1 = _pool_selection(H1, W1, pad_out=True)    # (807, 256)
_SEL2 = _pool_selection(H2, W2, pad_out=False)   # (205, 49)


# ------------------------------ fused kernel --------------------------------
def _cnn_fused_kernel(x_ref, w1_ref, b1_ref, s1_ref, w2_ref, b2_ref, s2_ref,
                      wf_ref, fb_ref, o_ref):
    # ---- conv1: 1 -> 8 channels, 3x3 pad 1, ReLU.  9-tap VPU stencil. ----
    x = x_ref[0]                                     # (1, 900) padded 30x30, row-flat
    w1 = w1_ref[...]                                 # (8, 9)
    acc1 = jnp.zeros((C1, G1), jnp.float32)
    for ky in range(3):
        for kx in range(3):
            k = ky * 3 + kx
            s = ky * WP1 + kx
            acc1 = acc1 + w1[:, k:k + 1] * x[:, s:s + G1]
    y1 = jnp.maximum(acc1 + b1_ref[...], 0.0)        # (8, 838) lane-dense

    # ---- pool1 (2x2/2) + zero re-pad to 16x16, via one selection matmul ----
    m1 = jnp.maximum(jnp.maximum(y1[:, 0:L1], y1[:, 1:L1 + 1]),
                     jnp.maximum(y1[:, WP1:WP1 + L1], y1[:, WP1 + 1:WP1 + 1 + L1]))
    x2 = jnp.dot(m1, s1_ref[...], preferred_element_type=jnp.float32)   # (8, 256)

    # ---- conv2: 8 -> 16 channels, 3x3 pad 1, ReLU.  im2col + one MXU matmul ----
    cols = [x2[:, ky * WP2 + kx: ky * WP2 + kx + G2]
            for ky in range(3) for kx in range(3)]
    a2 = jnp.concatenate(cols, axis=0)                                   # (72, 222)
    y2 = jnp.dot(w2_ref[...], a2, preferred_element_type=jnp.float32)
    y2 = jnp.maximum(y2 + b2_ref[...], 0.0)                              # (16, 222)

    # ---- pool2 (2x2/2) -> (16, 49), column j = ho*7 + wo ----
    m2 = jnp.maximum(jnp.maximum(y2[:, 0:L2], y2[:, 1:L2 + 1]),
                     jnp.maximum(y2[:, WP2:WP2 + L2], y2[:, WP2 + 1:WP2 + 1 + L2]))
    f = jnp.dot(m2, s2_ref[...], preferred_element_type=jnp.float32)     # (16, 49)

    # ---- fc1: out[o] = bf[o] + sum_{c,j} f[c,j] * wf[o, c*49+j] ----
    wf = wf_ref[...]                                  # (16, 49, 10)
    out = fb_ref[...]                                 # (1, 10)
    for c in range(C2):
        out = out + jnp.dot(f[c:c + 1, :], wf[c], preferred_element_type=jnp.float32)
    o_ref[...] = out.reshape(1, 1, NCLS).astype(o_ref.dtype)


# ------------------------------ host wrapper ---------------------------------
@jax.jit
def cnn_forward(x, params):
    w1, b1, w2, b2, wf, bf = params
    n, cin, h, w = x.shape
    assert (cin, h, w) == (CIN, H1, W1)

    # Input prep (input already lives in HBM; this is the only wrapper glue).
    xp = jnp.pad(x, ((0, 0), (0, 0), (1, 1), (1, 1))).reshape(n, CIN, P1)

    # Weight layout prep (done once per call, tiny).
    w1m = w1.transpose(0, 2, 3, 1).reshape(C1, 9 * CIN)       # (8, 9)
    b1m = b1.reshape(C1, 1)
    w2m = w2.transpose(0, 2, 3, 1).reshape(C2, 9 * C1)        # (16, 72)
    b2m = b2.reshape(C2, 1)
    wf3 = wf.reshape(NCLS, C2, T2).transpose(1, 2, 0)         # (16, 49, 10)
    fbm = bf.reshape(1, NCLS)
    sel1 = jnp.asarray(_SEL1)
    sel2 = jnp.asarray(_SEL2)

    out = pl.pallas_call(
        _cnn_fused_kernel,
        out_shape=jax.ShapeDtypeStruct((n, 1, NCLS), jnp.float32),
        grid=(n,),
        in_specs=[
            pl.BlockSpec((1, CIN, P1), lambda i: (i, 0, 0)),   # per-batch input
            pl.BlockSpec((C1, 9 * CIN), lambda i: (0, 0)),     # conv1 weights
            pl.BlockSpec((C1, 1), lambda i: (0, 0)),           # conv1 bias
            pl.BlockSpec((L1, P2), lambda i: (0, 0)),          # pool1 selection
            pl.BlockSpec((C2, 9 * C1), lambda i: (0, 0)),      # conv2 weights
            pl.BlockSpec((C2, 1), lambda i: (0, 0)),           # conv2 bias
            pl.BlockSpec((L2, T2), lambda i: (0, 0)),          # pool2 selection
            pl.BlockSpec((C2, T2, NCLS), lambda i: (0, 0, 0)), # fc weights
            pl.BlockSpec((1, NCLS), lambda i: (0, 0)),         # fc bias
        ],
        out_specs=pl.BlockSpec((1, 1, NCLS), lambda i: (i, 0, 0)),
        compiler_params=pltpu.CompilerParams(dimension_semantics=("parallel",)),
    )(xp, w1m, b1m, sel1, w2m, b2m, sel2, wf3, fbm)
    return out.reshape(n, NCLS)


# -------------------- pure-JAX reference (correctness only) ------------------
def cnn_reference(x, params):
    w1, b1, w2, b2, wf, bf = params

    def conv(x, w, b):
        y = jax.lax.conv_general_dilated(
            x, w, window_strides=(1, 1), padding=((1, 1), (1, 1)),
            dimension_numbers=("NCHW", "OIHW", "NCHW"))
        return jax.nn.relu(y + b[None, :, None, None])

    def pool(x):
        return jax.lax.reduce_window(
            x, jnp.array(-jnp.inf, x.dtype), jax.lax.max,
            (1, 1, 2, 2), (1, 1, 2, 2), "VALID")

    x = pool(conv(x, w1, b1))
    x = pool(conv(x, w2, b2))
    x = x.reshape(x.shape[0], -1)
    return x @ wf.T + bf


if __name__ == "__main__":
    in_channels, num_classes = CIN, NCLS
    key = jax.random.PRNGKey(0)
    ks = jax.random.split(key, 7)

    # Deterministic synthetic parameters (shapes from the PyTorch __init__).
    w1 = jax.random.normal(ks[0], (C1, in_channels, 3, 3), jnp.float32) / 3.0
    b1 = jax.random.normal(ks[1], (C1,), jnp.float32) * 0.1
    w2 = jax.random.normal(ks[2], (C2, C1, 3, 3), jnp.float32) / jnp.sqrt(72.0)
    b2 = jax.random.normal(ks[3], (C2,), jnp.float32) * 0.1
    wf = jax.random.normal(ks[4], (num_classes, C2 * 7 * 7), jnp.float32) / jnp.sqrt(784.0)
    bf = jax.random.normal(ks[5], (num_classes,), jnp.float32) * 0.1
    params = (w1, b1, w2, b2, wf, bf)

    # fc1 expects 16*7*7 features, so spatial must be 28x28 (MNIST-sized).
    x = jax.random.normal(ks[6], (2, in_channels, 28, 28), jnp.float32)

    out = jax.block_until_ready(cnn_forward(x, params))
    ref = jax.block_until_ready(cnn_reference(x, params))
    assert out.shape == (2, num_classes), out.shape
    assert jnp.allclose(out, ref, atol=1e-4, rtol=1e-4), float(jnp.max(jnp.abs(out - ref)))
    print("KERNEL_OK")
</pallas_src>

<mosaic_0001>
module attributes {stable_mosaic.version = 11 : i64} {
  func.func @_cnn_fused_kernel(%arg0: i32, %arg1: memref<1x1x900xf32, #tpu.memory_space<vmem>>, %arg2: memref<8x9xf32, #tpu.memory_space<vmem>>, %arg3: memref<8x1xf32, #tpu.memory_space<vmem>>, %arg4: memref<807x256xf32, #tpu.memory_space<vmem>>, %arg5: memref<16x72xf32, #tpu.memory_space<vmem>>, %arg6: memref<16x1xf32, #tpu.memory_space<vmem>>, %arg7: memref<205x49xf32, #tpu.memory_space<vmem>>, %arg8: memref<16x49x10xf32, #tpu.memory_space<vmem>>, %arg9: memref<1x10xf32, #tpu.memory_space<vmem>>, %arg10: memref<1x1x10xf32, #tpu.memory_space<vmem>>) attributes {dimension_semantics = [#tpu.dimension_semantics<parallel>], iteration_bounds = array<i64: 2>, scalar_prefetch = 0 : i64, scratch_operands = 0 : i64, tpu.core_type = #tpu.core_type<tc>, window_params = [{transform_indices = @transform_0, window_bounds = array<i64: 1, 1, 900>}, {pipeline_mode = #tpu.pipeline_mode<synchronous>, transform_indices = @transform_1, window_bounds = array<i64: 8, 9>}, {pipeline_mode = #tpu.pipeline_mode<synchronous>, transform_indices = @transform_2, window_bounds = array<i64: 8, 1>}, {pipeline_mode = #tpu.pipeline_mode<synchronous>, transform_indices = @transform_3, window_bounds = array<i64: 807, 256>}, {pipeline_mode = #tpu.pipeline_mode<synchronous>, transform_indices = @transform_4, window_bounds = array<i64: 16, 72>}, {pipeline_mode = #tpu.pipeline_mode<synchronous>, transform_indices = @transform_5, window_bounds = array<i64: 16, 1>}, {pipeline_mode = #tpu.pipeline_mode<synchronous>, transform_indices = @transform_6, window_bounds = array<i64: 205, 49>}, {pipeline_mode = #tpu.pipeline_mode<synchronous>, transform_indices = @transform_7, window_bounds = array<i64: 16, 49, 10>}, {pipeline_mode = #tpu.pipeline_mode<synchronous>, transform_indices = @transform_8, window_bounds = array<i64: 1, 10>}, {transform_indices = @transform_9, window_bounds = array<i64: 1, 1, 10>}]} {
    %c0 = arith.constant 0 : index
    %c0_0 = arith.constant 0 : index
    %c0_1 = arith.constant 0 : index
    %0 = vector.load %arg1[%c0, %c0_0, %c0_1] : memref<1x1x900xf32, #tpu.memory_space<vmem>>, vector<1x1x900xf32>
    %1 = vector.shape_cast %0 : vector<1x1x900xf32> to vector<1x900xf32>
    %c0_2 = arith.constant 0 : index
    %c0_3 = arith.constant 0 : index
    %2 = vector.load %arg2[%c0_2, %c0_3] : memref<8x9xf32, #tpu.memory_space<vmem>>, vector<8x9xf32>
    %cst = arith.constant 0.000000e+00 : f32
    %3 = vector.broadcast %cst : f32 to vector<8x838xf32>
    %4 = vector.extract_strided_slice %2 {offsets = [0, 0], sizes = [8, 1], strides = [1, 1]} : vector<8x9xf32> to vector<8x1xf32>
    %5 = vector.extract_strided_slice %1 {offsets = [0, 0], sizes = [1, 838], strides = [1, 1]} : vector<1x900xf32> to vector<1x838xf32>
    %6 = vector.broadcast %4 : vector<8x1xf32> to vector<8x838xf32>
    %7 = vector.broadcast %5 : vector<1x838xf32> to vector<8x838xf32>
    %8 = arith.mulf %6, %7 : vector<8x838xf32>
    %9 = arith.addf %3, %8 : vector<8x838xf32>
    %10 = vector.extract_strided_slice %2 {offsets = [0, 1], sizes = [8, 1], strides = [1, 1]} : vector<8x9xf32> to vector<8x1xf32>
    %11 = vector.extract_strided_slice %1 {offsets = [0, 1], sizes = [1, 838], strides = [1, 1]} : vector<1x900xf32> to vector<1x838xf32>
    %12 = vector.broadcast %10 : vector<8x1xf32> to vector<8x838xf32>
    %13 = vector.broadcast %11 : vector<1x838xf32> to vector<8x838xf32>
    %14 = arith.mulf %12, %13 : vector<8x838xf32>
    %15 = arith.addf %9, %14 : vector<8x838xf32>
    %16 = vector.extract_strided_slice %2 {offsets = [0, 2], sizes = [8, 1], strides = [1, 1]} : vector<8x9xf32> to vector<8x1xf32>
    %17 = vector.extract_strided_slice %1 {offsets = [0, 2], sizes = [1, 838], strides = [1, 1]} : vector<1x900xf32> to vector<1x838xf32>
    %18 = vector.broadcast %16 : vector<8x1xf32> to vector<8x838xf32>
    %19 = vector.broadcast %17 : vector<1x838xf32> to vector<8x838xf32>
    %20 = arith.mulf %18, %19 : vector<8x838xf32>
    %21 = arith.addf %15, %20 : vector<8x838xf32>
    %22 = vector.extract_strided_slice %2 {offsets = [0, 3], sizes = [8, 1], strides = [1, 1]} : vector<8x9xf32> to vector<8x1xf32>
    %23 = vector.extract_strided_slice %1 {offsets = [0, 30], sizes = [1, 838], strides = [1, 1]} : vector<1x900xf32> to vector<1x838xf32>
    %24 = vector.broadcast %22 : vector<8x1xf32> to vector<8x838xf32>
    %25 = vector.broadcast %23 : vector<1x838xf32> to vector<8x838xf32>
    %26 = arith.mulf %24, %25 : vector<8x838xf32>
    %27 = arith.addf %21, %26 : vector<8x838xf32>
    %28 = vector.extract_strided_slice %2 {offsets = [0, 4], sizes = [8, 1], strides = [1, 1]} : vector<8x9xf32> to vector<8x1xf32>
    %29 = vector.extract_strided_slice %1 {offsets = [0, 31], sizes = [1, 838], strides = [1, 1]} : vector<1x900xf32> to vector<1x838xf32>
    %30 = vector.broadcast %28 : vector<8x1xf32> to vector<8x838xf32>
    %31 = vector.broadcast %29 : vector<1x838xf32> to vector<8x838xf32>
    %32 = arith.mulf %30, %31 : vector<8x838xf32>
    %33 = arith.addf %27, %32 : vector<8x838xf32>
    %34 = vector.extract_strided_slice %2 {offsets = [0, 5], sizes = [8, 1], strides = [1, 1]} : vector<8x9xf32> to vector<8x1xf32>
    %35 = vector.extract_strided_slice %1 {offsets = [0, 32], sizes = [1, 838], strides = [1, 1]} : vector<1x900xf32> to vector<1x838xf32>
    %36 = vector.broadcast %34 : vector<8x1xf32> to vector<8x838xf32>
    %37 = vector.broadcast %35 : vector<1x838xf32> to vector<8x838xf32>
    %38 = arith.mulf %36, %37 : vector<8x838xf32>
    %39 = arith.addf %33, %38 : vector<8x838xf32>
    %40 = vector.extract_strided_slice %2 {offsets = [0, 6], sizes = [8, 1], strides = [1, 1]} : vector<8x9xf32> to vector<8x1xf32>
    %41 = vector.extract_strided_slice %1 {offsets = [0, 60], sizes = [1, 838], strides = [1, 1]} : vector<1x900xf32> to vector<1x838xf32>
    %42 = vector.broadcast %40 : vector<8x1xf32> to vector<8x838xf32>
    %43 = vector.broadcast %41 : vector<1x838xf32> to vector<8x838xf32>
    %44 = arith.mulf %42, %43 : vector<8x838xf32>
    %45 = arith.addf %39, %44 : vector<8x838xf32>
    %46 = vector.extract_strided_slice %2 {offsets = [0, 7], sizes = [8, 1], strides = [1, 1]} : vector<8x9xf32> to vector<8x1xf32>
    %47 = vector.extract_strided_slice %1 {offsets = [0, 61], sizes = [1, 838], strides = [1, 1]} : vector<1x900xf32> to vector<1x838xf32>
    %48 = vector.broadcast %46 : vector<8x1xf32> to vector<8x838xf32>
    %49 = vector.broadcast %47 : vector<1x838xf32> to vector<8x838xf32>
    %50 = arith.mulf %48, %49 : vector<8x838xf32>
    %51 = arith.addf %45, %50 : vector<8x838xf32>
    %52 = vector.extract_strided_slice %2 {offsets = [0, 8], sizes = [8, 1], strides = [1, 1]} : vector<8x9xf32> to vector<8x1xf32>
    %53 = vector.extract_strided_slice %1 {offsets = [0, 62], sizes = [1, 838], strides = [1, 1]} : vector<1x900xf32> to vector<1x838xf32>
    %54 = vector.broadcast %52 : vector<8x1xf32> to vector<8x838xf32>
    %55 = vector.broadcast %53 : vector<1x838xf32> to vector<8x838xf32>
    %56 = arith.mulf %54, %55 : vector<8x838xf32>
    %57 = arith.addf %51, %56 : vector<8x838xf32>
    %c0_4 = arith.constant 0 : index
    %c0_5 = arith.constant 0 : index
    %58 = vector.load %arg3[%c0_4, %c0_5] : memref<8x1xf32, #tpu.memory_space<vmem>>, vector<8x1xf32>
    %59 = vector.broadcast %58 : vector<8x1xf32> to vector<8x838xf32>
    %60 = arith.addf %57, %59 : vector<8x838xf32>
    %cst_6 = arith.constant 0.000000e+00 : f32
    %61 = vector.broadcast %cst_6 : f32 to vector<8x838xf32>
    %62 = arith.maximumf %60, %61 : vector<8x838xf32>
    %63 = vector.extract_strided_slice %62 {offsets = [0, 0], sizes = [8, 807], strides = [1, 1]} : vector<8x838xf32> to vector<8x807xf32>
    %64 = vector.extract_strided_slice %62 {offsets = [0, 1], sizes = [8, 807], strides = [1, 1]} : vector<8x838xf32> to vector<8x807xf32>
    %65 = arith.maximumf %63, %64 : vector<8x807xf32>
    %66 = vector.extract_strided_slice %62 {offsets = [0, 30], sizes = [8, 807], strides = [1, 1]} : vector<8x838xf32> to vector<8x807xf32>
    %67 = vector.extract_strided_slice %62 {offsets = [0, 31], sizes = [8, 807], strides = [1, 1]} : vector<8x838xf32> to vector<8x807xf32>
    %68 = arith.maximumf %66, %67 : vector<8x807xf32>
    %69 = arith.maximumf %65, %68 : vector<8x807xf32>
    %c0_7 = arith.constant 0 : index
    %c0_8 = arith.constant 0 : index
    %70 = vector.load %arg4[%c0_7, %c0_8] : memref<807x256xf32, #tpu.memory_space<vmem>>, vector<807x256xf32>
    %cst_9 = arith.constant dense<0.000000e+00> : vector<8x256xf32>
    %71 = tpu.matmul %69, %70, %cst_9 {dimension_numbers = #tpu.dot_dimension_numbers<[1], [0], [0], [1], [0, 0, 1, 1], [], []>} : vector<8x807xf32>, vector<807x256xf32>, vector<8x256xf32> -> vector<8x256xf32>
    %72 = vector.extract_strided_slice %71 {offsets = [0, 0], sizes = [8, 222], strides = [1, 1]} : vector<8x256xf32> to vector<8x222xf32>
    %73 = vector.extract_strided_slice %71 {offsets = [0, 1], sizes = [8, 222], strides = [1, 1]} : vector<8x256xf32> to vector<8x222xf32>
    %74 = vector.extract_strided_slice %71 {offsets = [0, 2], sizes = [8, 222], strides = [1, 1]} : vector<8x256xf32> to vector<8x222xf32>
    %75 = vector.extract_strided_slice %71 {offsets = [0, 16], sizes = [8, 222], strides = [1, 1]} : vector<8x256xf32> to vector<8x222xf32>
    %76 = vector.extract_strided_slice %71 {offsets = [0, 17], sizes = [8, 222], strides = [1, 1]} : vector<8x256xf32> to vector<8x222xf32>
    %77 = vector.extract_strided_slice %71 {offsets = [0, 18], sizes = [8, 222], strides = [1, 1]} : vector<8x256xf32> to vector<8x222xf32>
    %78 = vector.extract_strided_slice %71 {offsets = [0, 32], sizes = [8, 222], strides = [1, 1]} : vector<8x256xf32> to vector<8x222xf32>
    %79 = vector.extract_strided_slice %71 {offsets = [0, 33], sizes = [8, 222], strides = [1, 1]} : vector<8x256xf32> to vector<8x222xf32>
    %80 = vector.extract_strided_slice %71 {offsets = [0, 34], sizes = [8, 222], strides = [1, 1]} : vector<8x256xf32> to vector<8x222xf32>
    %81 = tpu.concatenate %72, %73, %74, %75, %76, %77, %78, %79, %80 in 0 : vector<8x222xf32>, vector<8x222xf32>, vector<8x222xf32>, vector<8x222xf32>, vector<8x222xf32>, vector<8x222xf32>, vector<8x222xf32>, vector<8x222xf32>, vector<8x222xf32> -> vector<72x222xf32>
    %c0_10 = arith.constant 0 : index
    %c0_11 = arith.constant 0 : index
    %82 = vector.load %arg5[%c0_10, %c0_11] : memref<16x72xf32, #tpu.memory_space<vmem>>, vector<16x72xf32>
    %cst_12 = arith.constant dense<0.000000e+00> : vector<16x222xf32>
    %83 = tpu.matmul %82, %81, %cst_12 {dimension_numbers = #tpu.dot_dimension_numbers<[1], [0], [0], [1], [0, 0, 1, 1], [], []>} : vector<16x72xf32>, vector<72x222xf32>, vector<16x222xf32> -> vector<16x222xf32>
    %c0_13 = arith.constant 0 : index
    %c0_14 = arith.constant 0 : index
    %84 = vector.load %arg6[%c0_13, %c0_14] : memref<16x1xf32, #tpu.memory_space<vmem>>, vector<16x1xf32>
    %85 = vector.broadcast %84 : vector<16x1xf32> to vector<16x222xf32>
    %86 = arith.addf %83, %85 : vector<16x222xf32>
    %cst_15 = arith.constant 0.000000e+00 : f32
    %87 = vector.broadcast %cst_15 : f32 to vector<16x222xf32>
    %88 = arith.maximumf %86, %87 : vector<16x222xf32>
    %89 = vector.extract_strided_slice %88 {offsets = [0, 0], sizes = [16, 205], strides = [1, 1]} : vector<16x222xf32> to vector<16x205xf32>
    %90 = vector.extract_strided_slice %88 {offsets = [0, 1], sizes = [16, 205], strides = [1, 1]} : vector<16x222xf32> to vector<16x205xf32>
    %91 = arith.maximumf %89, %90 : vector<16x205xf32>
    %92 = vector.extract_strided_slice %88 {offsets = [0, 16], sizes = [16, 205], strides = [1, 1]} : vector<16x222xf32> to vector<16x205xf32>
    %93 = vector.extract_strided_slice %88 {offsets = [0, 17], sizes = [16, 205], strides = [1, 1]} : vector<16x222xf32> to vector<16x205xf32>
    %94 = arith.maximumf %92, %93 : vector<16x205xf32>
    %95 = arith.maximumf %91, %94 : vector<16x205xf32>
    %c0_16 = arith.constant 0 : index
    %c0_17 = arith.constant 0 : index
    %96 = vector.load %arg7[%c0_16, %c0_17] : memref<205x49xf32, #tpu.memory_space<vmem>>, vector<205x49xf32>
    %cst_18 = arith.constant dense<0.000000e+00> : vector<16x49xf32>
    %97 = tpu.matmul %95, %96, %cst_18 {dimension_numbers = #tpu.dot_dimension_numbers<[1], [0], [0], [1], [0, 0, 1, 1], [], []>} : vector<16x205xf32>, vector<205x49xf32>, vector<16x49xf32> -> vector<16x49xf32>
    %c0_19 = arith.constant 0 : index
    %c0_20 = arith.constant 0 : index
    %c0_21 = arith.constant 0 : index
    %98 = vector.load %arg8[%c0_19, %c0_20, %c0_21] : memref<16x49x10xf32, #tpu.memory_space<vmem>>, vector<16x49x10xf32>
    %c0_22 = arith.constant 0 : index
    %c0_23 = arith.constant 0 : index
    %99 = vector.load %arg9[%c0_22, %c0_23] : memref<1x10xf32, #tpu.memory_space<vmem>>, vector<1x10xf32>
    %100 = vector.extract_strided_slice %97 {offsets = [0, 0], sizes = [1, 49], strides = [1, 1]} : vector<16x49xf32> to vector<1x49xf32>
    %101 = vector.extract_strided_slice %98 {offsets = [0, 0, 0], sizes = [1, 49, 10], strides = [1, 1, 1]} : vector<16x49x10xf32> to vector<1x49x10xf32>
    %102 = vector.shape_cast %101 : vector<1x49x10xf32> to vector<49x10xf32>
    %cst_24 = arith.constant dense<0.000000e+00> : vector<1x10xf32>
    %103 = tpu.matmul %100, %102, %cst_24 {dimension_numbers = #tpu.dot_dimension_numbers<[1], [0], [0], [1], [0, 0, 1, 1], [], []>} : vector<1x49xf32>, vector<49x10xf32>, vector<1x10xf32> -> vector<1x10xf32>
    %104 = arith.addf %99, %103 : vector<1x10xf32>
    %105 = vector.extract_strided_slice %97 {offsets = [1, 0], sizes = [1, 49], strides = [1, 1]} : vector<16x49xf32> to vector<1x49xf32>
    %106 = vector.extract_strided_slice %98 {offsets = [1, 0, 0], sizes = [1, 49, 10], strides = [1, 1, 1]} : vector<16x49x10xf32> to vector<1x49x10xf32>
    %107 = vector.shape_cast %106 : vector<1x49x10xf32> to vector<49x10xf32>
    %cst_25 = arith.constant dense<0.000000e+00> : vector<1x10xf32>
    %108 = tpu.matmul %105, %107, %cst_25 {dimension_numbers = #tpu.dot_dimension_numbers<[1], [0], [0], [1], [0, 0, 1, 1], [], []>} : vector<1x49xf32>, vector<49x10xf32>, vector<1x10xf32> -> vector<1x10xf32>
    %109 = arith.addf %104, %108 : vector<1x10xf32>
    %110 = vector.extract_strided_slice %97 {offsets = [2, 0], sizes = [1, 49], strides = [1, 1]} : vector<16x49xf32> to vector<1x49xf32>
    %111 = vector.extract_strided_slice %98 {offsets = [2, 0, 0], sizes = [1, 49, 10], strides = [1, 1, 1]} : vector<16x49x10xf32> to vector<1x49x10xf32>
    %112 = vector.shape_cast %111 : vector<1x49x10xf32> to vector<49x10xf32>
    %cst_26 = arith.constant dense<0.000000e+00> : vector<1x10xf32>
    %113 = tpu.matmul %110, %112, %cst_26 {dimension_numbers = #tpu.dot_dimension_numbers<[1], [0], [0], [1], [0, 0, 1, 1], [], []>} : vector<1x49xf32>, vector<49x10xf32>, vector<1x10xf32> -> vector<1x10xf32>
    %114 = arith.addf %109, %113 : vector<1x10xf32>
    %115 = vector.extract_strided_slice %97 {offsets = [3, 0], sizes = [1, 49], strides = [1, 1]} : vector<16x49xf32> to vector<1x49xf32>
    %116 = vector.extract_strided_slice %98 {offsets = [3, 0, 0], sizes = [1, 49, 10], strides = [1, 1, 1]} : vector<16x49x10xf32> to vector<1x49x10xf32>
    %117 = vector.shape_cast %116 : vector<1x49x10xf32> to vector<49x10xf32>
    %cst_27 = arith.constant dense<0.000000e+00> : vector<1x10xf32>
    %118 = tpu.matmul %115, %117, %cst_27 {dimension_numbers = #tpu.dot_dimension_numbers<[1], [0], [0], [1], [0, 0, 1, 1], [], []>} : vector<1x49xf32>, vector<49x10xf32>, vector<1x10xf32> -> vector<1x10xf32>
    %119 = arith.addf %114, %118 : vector<1x10xf32>
    %120 = vector.extract_strided_slice %97 {offsets = [4, 0], sizes = [1, 49], strides = [1, 1]} : vector<16x49xf32> to vector<1x49xf32>
    %121 = vector.extract_strided_slice %98 {offsets = [4, 0, 0], sizes = [1, 49, 10], strides = [1, 1, 1]} : vector<16x49x10xf32> to vector<1x49x10xf32>
    %122 = vector.shape_cast %121 : vector<1x49x10xf32> to vector<49x10xf32>
    %cst_28 = arith.constant dense<0.000000e+00> : vector<1x10xf32>
    %123 = tpu.matmul %120, %122, %cst_28 {dimension_numbers = #tpu.dot_dimension_numbers<[1], [0], [0], [1], [0, 0, 1, 1], [], []>} : vector<1x49xf32>, vector<49x10xf32>, vector<1x10xf32> -> vector<1x10xf32>
    %124 = arith.addf %119, %123 : vector<1x10xf32>
    %125 = vector.extract_strided_slice %97 {offsets = [5, 0], sizes = [1, 49], strides = [1, 1]} : vector<16x49xf32> to vector<1x49xf32>
    %126 = vector.extract_strided_slice %98 {offsets = [5, 0, 0], sizes = [1, 49, 10], strides = [1, 1, 1]} : vector<16x49x10xf32> to vector<1x49x10xf32>
    %127 = vector.shape_cast %126 : vector<1x49x10xf32> to vector<49x10xf32>
    %cst_29 = arith.constant dense<0.000000e+00> : vector<1x10xf32>
    %128 = tpu.matmul %125, %127, %cst_29 {dimension_numbers = #tpu.dot_dimension_numbers<[1], [0], [0], [1], [0, 0, 1, 1], [], []>} : vector<1x49xf32>, vector<49x10xf32>, vector<1x10xf32> -> vector<1x10xf32>
    %129 = arith.addf %124, %128 : vector<1x10xf32>
    %130 = vector.extract_strided_slice %97 {offsets = [6, 0], sizes = [1, 49], strides = [1, 1]} : vector<16x49xf32> to vector<1x49xf32>
    %131 = vector.extract_strided_slice %98 {offsets = [6, 0, 0], sizes = [1, 49, 10], strides = [1, 1, 1]} : vector<16x49x10xf32> to vector<1x49x10xf32>
    %132 = vector.shape_cast %131 : vector<1x49x10xf32> to vector<49x10xf32>
    %cst_30 = arith.constant dense<0.000000e+00> : vector<1x10xf32>
    %133 = tpu.matmul %130, %132, %cst_30 {dimension_numbers = #tpu.dot_dimension_numbers<[1], [0], [0], [1], [0, 0, 1, 1], [], []>} : vector<1x49xf32>, vector<49x10xf32>, vector<1x10xf32> -> vector<1x10xf32>
    %134 = arith.addf %129, %133 : vector<1x10xf32>
    %135 = vector.extract_strided_slice %97 {offsets = [7, 0], sizes = [1, 49], strides = [1, 1]} : vector<16x49xf32> to vector<1x49xf32>
    %136 = vector.extract_strided_slice %98 {offsets = [7, 0, 0], sizes = [1, 49, 10], strides = [1, 1, 1]} : vector<16x49x10xf32> to vector<1x49x10xf32>
    %137 = vector.shape_cast %136 : vector<1x49x10xf32> to vector<49x10xf32>
    %cst_31 = arith.constant dense<0.000000e+00> : vector<1x10xf32>
    %138 = tpu.matmul %135, %137, %cst_31 {dimension_numbers = #tpu.dot_dimension_numbers<[1], [0], [0], [1], [0, 0, 1, 1], [], []>} : vector<1x49xf32>, vector<49x10xf32>, vector<1x10xf32> -> vector<1x10xf32>
    %139 = arith.addf %134, %138 : vector<1x10xf32>
    %140 = vector.extract_strided_slice %97 {offsets = [8, 0], sizes = [1, 49], strides = [1, 1]} : vector<16x49xf32> to vector<1x49xf32>
    %141 = vector.extract_strided_slice %98 {offsets = [8, 0, 0], sizes = [1, 49, 10], strides = [1, 1, 1]} : vector<16x49x10xf32> to vector<1x49x10xf32>
    %142 = vector.shape_cast %141 : vector<1x49x10xf32> to vector<49x10xf32>
    %cst_32 = arith.constant dense<0.000000e+00> : vector<1x10xf32>
    %143 = tpu.matmul %140, %142, %cst_32 {dimension_numbers = #tpu.dot_dimension_numbers<[1], [0], [0], [1], [0, 0, 1, 1], [], []>} : vector<1x49xf32>, vector<49x10xf32>, vector<1x10xf32> -> vector<1x10xf32>
    %144 = arith.addf %139, %143 : vector<1x10xf32>
    %145 = vector.extract_strided_slice %97 {offsets = [9, 0], sizes = [1, 49], strides = [1, 1]} : vector<16x49xf32> to vector<1x49xf32>
    %146 = vector.extract_strided_slice %98 {offsets = [9, 0, 0], sizes = [1, 49, 10], strides = [1, 1, 1]} : vector<16x49x10xf32> to vector<1x49x10xf32>
    %147 = vector.shape_cast %146 : vector<1x49x10xf32> to vector<49x10xf32>
    %cst_33 = arith.constant dense<0.000000e+00> : vector<1x10xf32>
    %148 = tpu.matmul %145, %147, %cst_33 {dimension_numbers = #tpu.dot_dimension_numbers<[1], [0], [0], [1], [0, 0, 1, 1], [], []>} : vector<1x49xf32>, vector<49x10xf32>, vector<1x10xf32> -> vector<1x10xf32>
    %149 = arith.addf %144, %148 : vector<1x10xf32>
    %150 = vector.extract_strided_slice %97 {offsets = [10, 0], sizes = [1, 49], strides = [1, 1]} : vector<16x49xf32> to vector<1x49xf32>
    %151 = vector.extract_strided_slice %98 {offsets = [10, 0, 0], sizes = [1, 49, 10], strides = [1, 1, 1]} : vector<16x49x10xf32> to vector<1x49x10xf32>
    %152 = vector.shape_cast %151 : vector<1x49x10xf32> to vector<49x10xf32>
    %cst_34 = arith.constant dense<0.000000e+00> : vector<1x10xf32>
    %153 = tpu.matmul %150, %152, %cst_34 {dimension_numbers = #tpu.dot_dimension_numbers<[1], [0], [0], [1], [0, 0, 1, 1], [], []>} : vector<1x49xf32>, vector<49x10xf32>, vector<1x10xf32> -> vector<1x10xf32>
    %154 = arith.addf %149, %153 : vector<1x10xf32>
    %155 = vector.extract_strided_slice %97 {offsets = [11, 0], sizes = [1, 49], strides = [1, 1]} : vector<16x49xf32> to vector<1x49xf32>
    %156 = vector.extract_strided_slice %98 {offsets = [11, 0, 0], sizes = [1, 49, 10], strides = [1, 1, 1]} : vector<16x49x10xf32> to vector<1x49x10xf32>
    %157 = vector.shape_cast %156 : vector<1x49x10xf32> to vector<49x10xf32>
    %cst_35 = arith.constant dense<0.000000e+00> : vector<1x10xf32>
    %158 = tpu.matmul %155, %157, %cst_35 {dimension_numbers = #tpu.dot_dimension_numbers<[1], [0], [0], [1], [0, 0, 1, 1], [], []>} : vector<1x49xf32>, vector<49x10xf32>, vector<1x10xf32> -> vector<1x10xf32>
    %159 = arith.addf %154, %158 : vector<1x10xf32>
    %160 = vector.extract_strided_slice %97 {offsets = [12, 0], sizes = [1, 49], strides = [1, 1]} : vector<16x49xf32> to vector<1x49xf32>
    %161 = vector.extract_strided_slice %98 {offsets = [12, 0, 0], sizes = [1, 49, 10], strides = [1, 1, 1]} : vector<16x49x10xf32> to vector<1x49x10xf32>
    %162 = vector.shape_cast %161 : vector<1x49x10xf32> to vector<49x10xf32>
    %cst_36 = arith.constant dense<0.000000e+00> : vector<1x10xf32>
    %163 = tpu.matmul %160, %162, %cst_36 {dimension_numbers = #tpu.dot_dimension_numbers<[1], [0], [0], [1], [0, 0, 1, 1], [], []>} : vector<1x49xf32>, vector<49x10xf32>, vector<1x10xf32> -> vector<1x10xf32>
    %164 = arith.addf %159, %163 : vector<1x10xf32>
    %165 = vector.extract_strided_slice %97 {offsets = [13, 0], sizes = [1, 49], strides = [1, 1]} : vector<16x49xf32> to vector<1x49xf32>
    %166 = vector.extract_strided_slice %98 {offsets = [13, 0, 0], sizes = [1, 49, 10], strides = [1, 1, 1]} : vector<16x49x10xf32> to vector<1x49x10xf32>
    %167 = vector.shape_cast %166 : vector<1x49x10xf32> to vector<49x10xf32>
    %cst_37 = arith.constant dense<0.000000e+00> : vector<1x10xf32>
    %168 = tpu.matmul %165, %167, %cst_37 {dimension_numbers = #tpu.dot_dimension_numbers<[1], [0], [0], [1], [0, 0, 1, 1], [], []>} : vector<1x49xf32>, vector<49x10xf32>, vector<1x10xf32> -> vector<1x10xf32>
    %169 = arith.addf %164, %168 : vector<1x10xf32>
    %170 = vector.extract_strided_slice %97 {offsets = [14, 0], sizes = [1, 49], strides = [1, 1]} : vector<16x49xf32> to vector<1x49xf32>
    %171 = vector.extract_strided_slice %98 {offsets = [14, 0, 0], sizes = [1, 49, 10], strides = [1, 1, 1]} : vector<16x49x10xf32> to vector<1x49x10xf32>
    %172 = vector.shape_cast %171 : vector<1x49x10xf32> to vector<49x10xf32>
    %cst_38 = arith.constant dense<0.000000e+00> : vector<1x10xf32>
    %173 = tpu.matmul %170, %172, %cst_38 {dimension_numbers = #tpu.dot_dimension_numbers<[1], [0], [0], [1], [0, 0, 1, 1], [], []>} : vector<1x49xf32>, vector<49x10xf32>, vector<1x10xf32> -> vector<1x10xf32>
    %174 = arith.addf %169, %173 : vector<1x10xf32>
    %175 = vector.extract_strided_slice %97 {offsets = [15, 0], sizes = [1, 49], strides = [1, 1]} : vector<16x49xf32> to vector<1x49xf32>
    %176 = vector.extract_strided_slice %98 {offsets = [15, 0, 0], sizes = [1, 49, 10], strides = [1, 1, 1]} : vector<16x49x10xf32> to vector<1x49x10xf32>
    %177 = vector.shape_cast %176 : vector<1x49x10xf32> to vector<49x10xf32>
    %cst_39 = arith.constant dense<0.000000e+00> : vector<1x10xf32>
    %178 = tpu.matmul %175, %177, %cst_39 {dimension_numbers = #tpu.dot_dimension_numbers<[1], [0], [0], [1], [0, 0, 1, 1], [], []>} : vector<1x49xf32>, vector<49x10xf32>, vector<1x10xf32> -> vector<1x10xf32>
    %179 = arith.addf %174, %178 : vector<1x10xf32>
    %180 = vector.shape_cast %179 : vector<1x10xf32> to vector<1x1x10xf32>
    %c0_40 = arith.constant 0 : index
    %c0_41 = arith.constant 0 : index
    %c0_42 = arith.constant 0 : index
    %181 = vector.load %arg10[%c0_40, %c0_41, %c0_42] : memref<1x1x10xf32, #tpu.memory_space<vmem>>, vector<1x1x10xf32>
    tpu.vector_store %arg10[%c0_40, %c0_41, %c0_42], %180 {strides = array<i32>} : memref<1x1x10xf32, #tpu.memory_space<vmem>>, vector<1x1x10xf32>,
    return
  }
  func.func @transform_0(%arg0: i32) -> (i32, i32, i32) {
    %c0_i32 = arith.constant 0 : i32
    %c0_i32_0 = arith.constant 0 : i32
    %c0_i32_1 = arith.constant 0 : i32
    return %arg0, %c0_i32, %c0_i32_0 : i32, i32, i32
  }
  func.func @transform_1(%arg0: i32) -> (i32, i32) {
    %c0_i32 = arith.constant 0 : i32
    %c0_i32_0 = arith.constant 0 : i32
    %c0_i32_1 = arith.constant 0 : i32
    return %c0_i32, %c0_i32_0 : i32, i32
  }
  func.func @transform_2(%arg0: i32) -> (i32, i32) {
    %c0_i32 = arith.constant 0 : i32
    %c0_i32_0 = arith.constant 0 : i32
    %c0_i32_1 = arith.constant 0 : i32
    return %c0_i32, %c0_i32_0 : i32, i32
  }
  func.func @transform_3(%arg0: i32) -> (i32, i32) {
    %c0_i32 = arith.constant 0 : i32
    %c0_i32_0 = arith.constant 0 : i32
    %c0_i32_1 = arith.constant 0 : i32
    return %c0_i32, %c0_i32_0 : i32, i32
  }
  func.func @transform_4(%arg0: i32) -> (i32, i32) {
    %c0_i32 = arith.constant 0 : i32
    %c0_i32_0 = arith.constant 0 : i32
    %c0_i32_1 = arith.constant 0 : i32
    return %c0_i32, %c0_i32_0 : i32, i32
  }
  func.func @transform_5(%arg0: i32) -> (i32, i32) {
    %c0_i32 = arith.constant 0 : i32
    %c0_i32_0 = arith.constant 0 : i32
    %c0_i32_1 = arith.constant 0 : i32
    return %c0_i32, %c0_i32_0 : i32, i32
  }
  func.func @transform_6(%arg0: i32) -> (i32, i32) {
    %c0_i32 = arith.constant 0 : i32
    %c0_i32_0 = arith.constant 0 : i32
    %c0_i32_1 = arith.constant 0 : i32
    return %c0_i32, %c0_i32_0 : i32, i32
  }
  func.func @transform_7(%arg0: i32) -> (i32, i32, i32) {
    %c0_i32 = arith.constant 0 : i32
    %c0_i32_0 = arith.constant 0 : i32
    %c0_i32_1 = arith.constant 0 : i32
    %c0_i32_2 = arith.constant 0 : i32
    return %c0_i32, %c0_i32_0, %c0_i32_1 : i32, i32, i32
  }
  func.func @transform_8(%arg0: i32) -> (i32, i32) {
    %c0_i32 = arith.constant 0 : i32
    %c0_i32_0 = arith.constant 0 : i32
    %c0_i32_1 = arith.constant 0 : i32
    return %c0_i32, %c0_i32_0 : i32, i32
  }
  func.func @transform_9(%arg0: i32) -> (i32, i32, i32) {
    %c0_i32 = arith.constant 0 : i32
    %c0_i32_0 = arith.constant 0 : i32
    %c0_i32_1 = arith.constant 0 : i32
    return %arg0, %c0_i32, %c0_i32_0 : i32, i32, i32
  }
}

</mosaic_0001>

<bundles_post_ra>
// kernel: cnn_forward.1
= control target key start
LH: loop header
LB: loop body
LE: loop exit
PB: predicated region body
PF: predicated region fallthrough
CT: control target
= control target key end

     0   :  { %14 = vsyncpa [#allocation3], 0  ;;  %s6156_s0 = inlined_call_operand.vmem [shape: f32[2,1,900], index: 0, kind: input, shape index: {}]   ;;  %s6157_s1 = inlined_call_operand.vmem [shape: f32[8,9], index: 1, kind: input, shape index: {}]   ;;  %s6158_s2 = inlined_call_operand.vmem [shape: f32[8,1], index: 2, kind: input, shape index: {}]   ;;  %s6159_s3 = inlined_call_operand.vmem [shape: f32[807,256], index: 3, kind: input, shape index: {}]   ;;  %s6160_s4 = inlined_call_operand.vmem [shape: f32[16,72], index: 4, kind: input, shape index: {}]   ;;  %s6161_s5 = inlined_call_operand.vmem [shape: f32[16,1], index: 5, kind: input, shape index: {}]   ;;  %s6162_s6 = inlined_call_operand.hbm [shape: f32[205,49], index: 6, kind: input, shape index: {}]   ;;  %s6163_s7 = inlined_call_operand.vmem [shape: f32[16,49,10], index: 7, kind: input, shape index: {}]   ;;  %s6164_s8 = inlined_call_operand.vmem [shape: f32[1,10], index: 8, kind: input, shape index: {}]   ;;  %s6165_s9 = inlined_call_operand.hbm [shape: f32[2,1,10], index: 9, kind: output, shape index: {}]  }
   0x1   :  { %15 = vsyncpa [#allocation4], 0 }
   0x2   :  { %17 = vsyncpa [#allocation4 + $0x1], 0  ;;  %s4403_s30 = smov 0   ;;  %s4405_s10 = smov 0  }
   0x3   :  { %s4407_s11 = smov 0   ;;  %s4409_s12 = smov 0  }
   0x4 LB: > { %s4424_s13 = sadd.s32 4294967295, %s4321_s12   ;;  %s3192_s14 = sadd.s32 4294967294, %s4321_s12   ;;  %s4321_s12 = sphi %s4409_s12, %s6188_s12   ;;  %s4317_s11 = sphi %s4407_s11, %s6187_s11   ;;  %s4313_s10 = sphi %s4405_s10, %s6186_s10   ;;  %s4309_s30 = sphi %s4403_s30, %s6185_s30  }
   0x5   : > { %s4428_s15 = sadd.s32 1, %s4321_s12   ;;  %s224_s16 = sadd.s32 1, %s4317_s11 }
   0x6   : > { %s221_s17 = ssub.s32 %s4321_s12, %s4428_s15  ;;  %p234_p0 = scmp.ne.s32.totalorder %s4317_s11, %s4313_s10 }
   0x7   : > { %p222_p1 = scmp.eq.s32.totalorder %s221_s17, 0  ;;  %p235_p2 = scmp.eq.s32.totalorder %s4424_s13, 1 }
   0x8   : > { %p240_p3 = scmp.ne.s32.totalorder %s4313_s10, %s4309_s30  ;;  %p241_p4 = scmp.eq.s32.totalorder %s3192_s14, 1 }
   0x9   : > { %s4439_s18 = scalar_select %p222_p1, %s4317_s11, %s224_s16  }
   0xa   : > { %p4441_p5 = por %p235_p2, %p234_p0  ;;  %p4445_p6 = por %p241_p4, %p240_p3 }
   0xb   : > { %p3193_p7 = scmp.ge.s32.totalorder %s4321_s12, 1  ;;  %p248_p8 = scmp.lt.s32.totalorder %s4321_s12, 3 }
   0xc   : > { %s6173_s19 = scalar_select %p4441_p5, 1, 0 }
   0xd   : > { %s6174_s20 = scalar_select %p4445_p6, 1, 0 }
   0xe   : > { %p6166_p9 = scmp.eq.s32.totalorder %s4424_s13, 0  ;;  %p4452_p10 = pnand %p3193_p7, %p248_p8 }
   0xf   : > { %s4323_s22 = smov [#allocation2]   ;;  %s4227_s27 = scalar_lea.hbm %s6162_s6, 3328 }
  0x10   : > { %s6175_s21 = scalar_select %p4452_p10, 1, 0 }
  0x11   : > { %s275_s23 = sshll.u32 %s4323_s22, 4  ;;  %p4085_p11 = pneg %p4452_p10  ;;  %s276_s23 = int_to_ptr.vmem [resolvable:$true] %s275_s23 }
  0x12   : > { %p4228_p13 = scmp.ne.s32.totalorder %s6162_s6, %s4227_s27  ;;  %p4234_p3 = scmp.lt.u32.totalorder %s4227_s27, %s6162_s6 }
  0x13   : > { %p4460_p12 = pnand %p6166_p9, %p4085_p11 }
  0x15   : > { %p4229_p0 = pneg %p4460_p12 }
  0x17   : > { %p4230_p1 = pnand %p4229_p0, %p4228_p13 }
  0x19   : > { %p4231_p2 = pneg %p4230_p1 }
  0x1b   : > { %p4236_p4 = pnand %p4234_p3, %p4231_p2 }
  0x1d   : > { %4239 = shalt.err (!%p4236_p4)
}
  0x1e   : > { %s4240_s17 = scalar_lea.vmem %s276_s23, 3328  ;;  %p4248_p9 = scmp.lt.s32.totalorder %s276_s23, %s276_s23 }
  0x1f   : > { %p4241_p7 = scmp.ne.s32.totalorder %s276_s23, %s4240_s17  ;;  %p4249_p6 = scmp.lt.s32.totalorder %s4240_s17, %s4240_s17 }
  0x21   : > { %p4243_p8 = pnand %p4241_p7, %p4229_p0  ;;  %p4250_p5 = por %p4249_p6, %p4248_p9 }
  0x23   : > { %p4244_p11 = pneg %p4243_p8 }
  0x25   : > { %p4251_p10 = pnand %p4250_p5, %p4244_p11 }
  0x27   : > { %4254 = shalt.err (!%p4251_p10)
}
  0x28   : > { %s4324_s22 = smov 128   ;;  %s4325_s25 = smov 8  }
  0x29   : > { %4088 = dma.hbm_to_vmem [thread:$0]  (!%p4460_p12), %s6162_s6, 3328, %s276_s23, [#allocation3], %s4324_s22, %s4324_s22, %s4325_s25  }
  0x2a   : > { %p6177_p13 = scmp.ne.s32.totalorder %s6175_s21, 0 }
  0x2b   : > { %p6178_p1 = scmp.eq.s32.totalorder (!%p6177_p13), %s4424_s13, 0 }
  0x2c   : > { %304 = sbr.rel (%p6177_p13) target bundleno = 2236 (0x8bc), region = 56 }
  0x33   : > { %4300 = dma.done.wait (%p6178_p1), [#allocation3], 3328   ;;  %p6179_p0 = pmov %p6178_p1 }
  0x34   : > { %v4326_v0 = vmov 1   ;;  %v4327_v1 = vmov 3   ;;  %p338_p5 = scmp.lt.s32.totalorder %s4424_s13, 1  ;;  %v350_v2 = vlaneseq  ;;  %v343_v4 = vld [vmem:[%s6157_s1] sm:$0xff]  ;;  %v4328_v10 = vmov 2   ;;  %s4335_s25 = smov 127  }
  0x35   : > { %4302 = vsyncadd (%p6179_p0), [#allocation3], 4294963968  ;;  %4157 = vset.pattern.permute.xlu0 %v4326_v0  ;;  %4159 = vset.pattern.permute.xlu1 %v4327_v1  ;;  %v4329_v11 = vmov 4   ;;  %v4330_v12 = vmov 5   ;;  %v4331_v13 = vmov 6   ;;  %v4332_v14 = vmov 7  }
  0x36   : > { %s339_s24 = scalar_select %p338_p5, %s4424_s13, 1  ;;  %v351_v3 = vshrl.u32 %v350_v2, 7  ;;  %400 = vperm.xlu0 %4157, %v343_v4   ;;  %506 = vperm.xlu1 %4159, %v343_v4   ;;  %v4333_v15 = vmov 0   ;;  %v4334_v16 = vmov 8   ;;  %v843_v17 = vld [vmem:[%s6158_s2] sm:$0xff]  ;;  %vm431_vm0 = vcmask 1039360  }
  0x37   : > { %s6170_s26 = smov 126   ;;  %s6171_s28 = smov 98   ;;  %vm484_vm1 = vcmask 1031168   ;;  %vm537_vm2 = vcmask 801792   ;;  %vm590_vm3 = vcmask 793600   ;;  %vm643_vm4 = vcmask 785408  }
  0x38   : > { %s3198_s23 = sshll.u32 %s339_s24, 3  ;;  %v372_v6 = vsub.s32 5, %v351_v3  ;;  %v376_v7 = vsub.s32 6, %v351_v3  ;;  %v670_v18 = vsub.s32 7, %v351_v3  ;;  %v364_v20 = vsub.s32 3, %v351_v3  ;;  %s4338_s24 = smov 97  }
  0x39   : > { %s341_s29 = scalar_lea.vmem %s6156_s0, %s3198_s23  ;;  %v356_v21 = vsub.s32 1, %v351_v3  ;;  %v360_v24 = vsub.s32 2, %v351_v3  ;;  %v352_v25 = vsub.s32 0, %v351_v3  ;;  %v368_v27 = vsub.s32 4, %v351_v3  ;;  %s6169_s23 = smov 96  }
  0x3a   : > { %v342_v5 = vld [vmem:[%s341_s29] sm:$0xff]  ;;  %4158 = vset.pattern.permute.xlu0 %v4328_v10  ;;  %4160 = vset.pattern.permute.xlu1 %v4329_v11  ;;  %s4340_s27 = smov 68   ;;  %s4341_s21 = smov 67   ;;  %vm705_vm5 = vcmask 556032   ;;  %vm763_vm6 = vcmask 547840   ;;  %vm821_vm7 = vcmask 539648  }
  0x3b   : > { %v4494_v8 = vrot.slane %v342_v5, %v372_v6  ;;  %v4496_v9 = vrot.slane %v342_v5, %v376_v7  ;;  %453 = vperm.xlu0 %4158, %v343_v4   ;;  %559 = vperm.xlu1 %4160, %v343_v4   ;;  %v671_v19 = vrot.slane %v342_v5, %v670_v18  ;;  %s4342_s29 = smov 66   ;;  %s6180_s14 = smov 98   ;;  %vm1151_vm8 = vcmask 1046528  }
  0x3c   : > { %v4501_v22 = vrot.slane %v342_v5, %v364_v20  ;;  %v4503_v23 = vrot.slane %v342_v5, %v356_v21  ;;  %v4507_v30 = vrot.slane %v342_v5, %v360_v24  ;;  %v4509_v31 = vrot.slane %v342_v5, %v352_v25  ;;  %s4344_s22 = smov 111   ;;  %p6183_p9 = scmp.ne.s32.totalorder %s6173_s19, 0 }
  0x3d   : > { %v4523_v38 = vrot.slane %v342_v5, %v368_v27  ;;  %vm1147_vm9 = vcmask 318464   ;;  %vm1462_vm10 = vcmask 916480   ;;  %vm1470_vm11 = vcmask 908288  }
  0x3e   : > { %vm1478_vm12 = vcmask 900096   ;;  %vm1493_vm13 = vcmask 777216   ;;  %vm1501_vm14 = vcmask 769024   ;;  %vm1519_vm15 = vcmask 588800  }
  0x3f   : > { %4161 = vset.pattern.permute.xlu1 %v4330_v12  ;;  %4162 = vset.pattern.permute.xlu0 %v4331_v13 }
  0x40   : > { %612 = vperm.xlu1 %4161, %v343_v4   ;;  %665 = vperm.xlu0 %4162, %v343_v4  }
  0x44   : > { %4163 = vset.pattern.permute.xlu1 %v4332_v14  ;;  %4165 = vset.pattern.permute.xlu0 %v4333_v15 }
  0x45   : > { %728 = vperm.xlu1 %4163, %v343_v4   ;;  %346 = vperm.xlu0 %4165, %v343_v4  }
  0x49   : > { %4164 = vset.pattern.permute.xlu1 %v4334_v16 }
  0x4a   : > { %786 = vperm.xlu1 %4164, %v343_v4  }
  0x4e   : > { %4166 = vset.pattern.permute.xlu1 %v4333_v15 }
  0x4f   : > { %846 = vperm.xlu1 %4166, %v843_v17  }
  0xb5   : > { %v401_v26 = vpop.permute.xlu0 %400  ;;  %v4511_v32 = vpop.permute.xlu1 %506 }
  0xb6   : > { %v406_v28 = vmul.f32 %v401_v26, %v4501_v22  ;;  %v404_v29 = vmul.f32 %v401_v26, %v4503_v23  ;;  %v4516_v33 = vmul.f32 %v401_v26, %v4494_v8  ;;  %v4519_v34 = vmul.f32 %v401_v26, %v4496_v9 }
  0xb7   : > { %v405_v35 = vmul.f32 %v401_v26, %v4507_v30  ;;  %v403_v36 = vmul.f32 %v401_v26, %v4509_v31  ;;  %v407_v42 = vmul.f32 %v401_v26, %v4523_v38  ;;  %v510_v51 = vmul.f32 %v4511_v32, %v4503_v23 }
  0xb8   : > { %423 = vrot.lane.b32.xlu0 %v406_v28, %s4335_s25  ;;  %419 = vrot.lane.b32.xlu1 %v404_v29, %s4335_s25  ;;  %v512_v57 = vmul.f32 %v4511_v32, %v4501_v22  ;;  %v511_v59 = vmul.f32 %v4511_v32, %v4507_v30  ;;  %v509_v60 = vmul.f32 %v4511_v32, %v4509_v31 }
  0xb9   : > { %v513_v62 = vmul.f32 %v4511_v32, %v4523_v38  ;;  %v514_v27 = vmul.f32 %v4511_v32, %v4494_v8  ;;  %v515_v28 = vmul.f32 %v4511_v32, %v4496_v9 }
  0xba   : > { %v454_v37 = vpop.permute.xlu0 %453  ;;  %v560_v39 = vpop.permute.xlu1 %559 }
  0xbb   : > { %v458_v40 = vmul.f32 %v454_v37, %v4507_v30  ;;  %v4529_v41 = vmul.f32 %v454_v37, %v4494_v8  ;;  %v4533_v43 = vmul.f32 %v454_v37, %v4496_v9  ;;  %v4536_v44 = vmul.f32 %v560_v39, %v4494_v8 }
  0xbc   : > { %421 = vrot.lane.b32.xlu1 %v405_v35, %s4335_s25  ;;  %417 = vrot.lane.b32.xlu0 %v403_v36, %s4335_s25  ;;  %v4539_v45 = vmul.f32 %v560_v39, %v4496_v9  ;;  %v457_v48 = vmul.f32 %v454_v37, %v4503_v23  ;;  %v460_v49 = vmul.f32 %v454_v37, %v4523_v38 }
  0xbd   : > { %v459_v53 = vmul.f32 %v454_v37, %v4501_v22  ;;  %v456_v56 = vmul.f32 %v454_v37, %v4509_v31  ;;  %v564_v61 = vmul.f32 %v560_v39, %v4507_v30  ;;  %v563_v63 = vmul.f32 %v560_v39, %v4503_v23 }
  0xbe   : > { %v566_v0 = vmul.f32 %v560_v39, %v4523_v38  ;;  %v565_v2 = vmul.f32 %v560_v39, %v4501_v22  ;;  %v562_v3 = vmul.f32 %v560_v39, %v4509_v31 }
  0xbf   : > { %v4543_v46 = vpop.permute.xlu0 %665  ;;  %v4545_v47 = vpop.permute.xlu1 %612 }
  0xc0   : > { %425 = vrot.lane.b32.xlu1 %v407_v42, %s4335_s25  ;;  %474 = vrot.lane.b32.xlu0 %v458_v40, %s6170_s26  ;;  %v4550_v50 = vmul.f32 %v671_v19, %v4543_v46  ;;  %v616_v1 = vmul.f32 %v4545_v47, %v4503_v23  ;;  %v618_v4 = vmul.f32 %v4545_v47, %v4501_v22 }
  0xc1   : > { %v617_v5 = vmul.f32 %v4545_v47, %v4507_v30  ;;  %v615_v6 = vmul.f32 %v4545_v47, %v4509_v31  ;;  %v675_v7 = vmul.f32 %v4543_v46, %v4507_v30  ;;  %v619_v10 = vmul.f32 %v4545_v47, %v4523_v38 }
  0xc2   : > { %v674_v11 = vmul.f32 %v4543_v46, %v4503_v23  ;;  %v677_v12 = vmul.f32 %v4543_v46, %v4523_v38  ;;  %v676_v13 = vmul.f32 %v4543_v46, %v4501_v22  ;;  %v673_v14 = vmul.f32 %v4543_v46, %v4509_v31 }
  0xc3   : > { %v620_v29 = vmul.f32 %v4545_v47, %v4494_v8  ;;  %v678_v32 = vmul.f32 %v4543_v46, %v4494_v8 }
  0xc4   : > { %472 = vrot.lane.b32.xlu1 %v457_v48, %s6170_s26  ;;  %478 = vrot.lane.b32.xlu0 %v460_v49, %s6170_s26  ;;  %v4556_v52 = vpop.permute.xlu1 %728 }
  0xc5   : > { %v4562_v54 = vmul.f32 %v4556_v52, %v671_v19  ;;  %v732_v15 = vmul.f32 %v4556_v52, %v4503_v23  ;;  %v733_v16 = vmul.f32 %v4556_v52, %v4507_v30  ;;  %v734_v17 = vmul.f32 %v4556_v52, %v4501_v22 }
  0xc6   : > { %v735_v18 = vmul.f32 %v4556_v52, %v4523_v38  ;;  %v731_v20 = vmul.f32 %v4556_v52, %v4509_v31  ;;  %v736_v35 = vmul.f32 %v4556_v52, %v4494_v8  ;;  %v737_v36 = vmul.f32 %v4556_v52, %v4496_v9 }
  0xc8   : > { %476 = vrot.lane.b32.xlu1 %v459_v53, %s6170_s26  ;;  %525 = vrot.lane.b32.xlu0 %v510_v51, %s6171_s28 }
  0xc9   : > { %v4564_v55 = vpop.permute.xlu1 %786 }
  0xca   : > { %v4570_v58 = vmul.f32 %v4564_v55, %v671_v19  ;;  %v790_v19 = vmul.f32 %v4564_v55, %v4503_v23  ;;  %v791_v21 = vmul.f32 %v4564_v55, %v4507_v30  ;;  %v792_v24 = vmul.f32 %v4564_v55, %v4501_v22 }
  0xcb   : > { %v793_v25 = vmul.f32 %v4564_v55, %v4523_v38  ;;  %v789_v26 = vmul.f32 %v4564_v55, %v4509_v31  ;;  %v794_v37 = vmul.f32 %v4564_v55, %v4494_v8  ;;  %v795_v39 = vmul.f32 %v4564_v55, %v4496_v9 }
  0xcc   : > { %470 = vrot.lane.b32.xlu1 %v456_v56, %s6170_s26  ;;  %529 = vrot.lane.b32.xlu0 %v512_v57, %s6171_s28 }
  0xce   : > { %v4695_v40 = vpop.permute.xlu1 %846 }
  0xd0   : > { %527 = vrot.lane.b32.xlu1 %v511_v59, %s6171_s28  ;;  %523 = vrot.lane.b32.xlu0 %v509_v60, %s6171_s28 }
  0xd4   : > { %531 = vrot.lane.b32.xlu1 %v513_v62, %s6171_s28  ;;  %580 = vrot.lane.b32.xlu0 %v564_v61, %s4338_s24 }
  0xd8   : > { %578 = vrot.lane.b32.xlu1 %v563_v63, %s4338_s24  ;;  %584 = vrot.lane.b32.xlu0 %v566_v0, %s4338_s24 }
  0xdc   : > { %582 = vrot.lane.b32.xlu1 %v565_v2, %s4338_s24  ;;  %631 = vrot.lane.b32.xlu0 %v616_v1, %s6169_s23 }
  0xe0   : > { %576 = vrot.lane.b32.xlu1 %v562_v3, %s4338_s24  ;;  %635 = vrot.lane.b32.xlu0 %v618_v4, %s6169_s23 }
  0xe4   : > { %633 = vrot.lane.b32.xlu1 %v617_v5, %s6169_s23  ;;  %629 = vrot.lane.b32.xlu0 %v615_v6, %s6169_s23 }
  0xe8   : > { %637 = vrot.lane.b32.xlu1 %v619_v10, %s6169_s23  ;;  %693 = vrot.lane.b32.xlu0 %v675_v7, %s4340_s27 }
  0xec   : > { %691 = vrot.lane.b32.xlu1 %v674_v11, %s4340_s27  ;;  %697 = vrot.lane.b32.xlu0 %v677_v12, %s4340_s27 }
  0xf0   : > { %695 = vrot.lane.b32.xlu1 %v676_v13, %s4340_s27  ;;  %689 = vrot.lane.b32.xlu0 %v673_v14, %s4340_s27 }
  0xf4   : > { %749 = vrot.lane.b32.xlu1 %v732_v15, %s4341_s21  ;;  %751 = vrot.lane.b32.xlu0 %v733_v16, %s4341_s21 }
  0xf8   : > { %753 = vrot.lane.b32.xlu1 %v734_v17, %s4341_s21  ;;  %755 = vrot.lane.b32.xlu0 %v735_v18, %s4341_s21 }
  0xfc   : > { %747 = vrot.lane.b32.xlu1 %v731_v20, %s4341_s21  ;;  %807 = vrot.lane.b32.xlu0 %v790_v19, %s4342_s29 }
 0x100   : > { %809 = vrot.lane.b32.xlu1 %v791_v21, %s4342_s29  ;;  %811 = vrot.lane.b32.xlu0 %v792_v24, %s4342_s29 }
 0x104   : > { %813 = vrot.lane.b32.xlu1 %v793_v25, %s4342_s29  ;;  %805 = vrot.lane.b32.xlu0 %v789_v26, %s4342_s29 }
 0x108   : > { %427 = vrot.lane.b32.xlu1 %v4516_v33, %s4335_s25  ;;  %429 = vrot.lane.b32.xlu0 %v4519_v34, %s4335_s25  ;;  %v621_v33 = vmul.f32 %v4545_v47, %v4496_v9  ;;  %v679_v34 = vmul.f32 %v4543_v46, %v4496_v9 }
 0x10c   : > { %480 = vrot.lane.b32.xlu1 %v4529_v41, %s6170_s26  ;;  %482 = vrot.lane.b32.xlu0 %v4533_v43, %s6170_s26  ;;  %v4697_v41 = vpop.permute.xlu0 %346  ;;  %s6182_s26 = smov 96  }
 0x10d   : > { %v387_v15 = vmul.f32 %v4507_v30, %v4697_v41  ;;  %v386_v16 = vmul.f32 %v4503_v23, %v4697_v41  ;;  %v385_v17 = vmul.f32 %v4509_v31, %v4697_v41  ;;  %v388_v18 = vmul.f32 %v4501_v22, %v4697_v41 }
 0x110   : > { %533 = vrot.lane.b32.xlu1 %v514_v27, %s6171_s28  ;;  %535 = vrot.lane.b32.xlu0 %v515_v28, %s6171_s28  ;;  %s4347_s28 = smov 94  }
 0x114   : > { %586 = vrot.lane.b32.xlu1 %v4536_v44, %s4338_s24  ;;  %588 = vrot.lane.b32.xlu0 %v4539_v45, %s4338_s24  ;;  %s4345_s24 = smov 112  }
 0x118   : > { %639 = vrot.lane.b32.xlu1 %v620_v29, %s6169_s23  ;;  %641 = vrot.lane.b32.xlu0 %v621_v33, %s6169_s23  ;;  %s4346_s23 = smov 110  }
 0x11c   : > { %699 = vrot.lane.b32.xlu1 %v678_v32, %s4340_s27  ;;  %701 = vrot.lane.b32.xlu0 %v679_v34, %s4340_s27 }
 0x120   : > { %757 = vrot.lane.b32.xlu1 %v736_v35, %s4341_s21  ;;  %759 = vrot.lane.b32.xlu0 %v737_v36, %s4341_s21 }
 0x124   : > { %815 = vrot.lane.b32.xlu1 %v794_v37, %s4342_s29  ;;  %817 = vrot.lane.b32.xlu0 %v795_v39, %s4342_s29 }
 0x12a   : > { %v424_v42 = vpop.permute.xlu0 %423  ;;  %v420_v43 = vpop.permute.xlu1 %419 }
 0x12e   : > { %v422_v44 = vpop.permute.xlu1 %421  ;;  %v418_v45 = vpop.permute.xlu0 %417 }
 0x12f   : > { %v433_v13 = vsel %vm431_vm0, %v420_v43, %v422_v44  ;;  %v434_v14 = vsel %vm431_vm0, %v422_v44, %v424_v42  ;;  %v432_v23 = vsel %vm431_vm0, %v418_v45, %v420_v43 }
 0x130   : > { %v446_v21 = vadd.f32 %v433_v13, %v386_v16  ;;  %v447_v24 = vadd.f32 %v434_v14, %v387_v15  ;;  %v445_v35 = vadd.f32 %v432_v23, %v385_v17 }
 0x132   : > { %v4699_v46 = vpop.permute.xlu1 %425  ;;  %v475_v47 = vpop.permute.xlu0 %474 }
 0x133   : > { %v435_v31 = vsel %vm431_vm0, %v424_v42, %v4699_v46 }
 0x134   : > { %v448_v36 = vadd.f32 %v435_v31, %v388_v18 }
 0x136   : > { %v473_v48 = vpop.permute.xlu1 %472  ;;  %v4701_v49 = vpop.permute.xlu0 %478 }
 0x137   : > { %v486_v19 = vsel %vm484_vm1, %v473_v48, %v475_v47 }
 0x138   : > { %v499_v27 = vadd.f32 %v486_v19, %v446_v21 }
 0x13a   : > { %v477_v51 = vpop.permute.xlu1 %476  ;;  %v526_v52 = vpop.permute.xlu0 %525 }
 0x13b   : > { %v487_v20 = vsel %vm484_vm1, %v475_v47, %v477_v51  ;;  %v488_v29 = vsel %vm484_vm1, %v477_v51, %v4701_v49 }
 0x13c   : > { %v500_v28 = vadd.f32 %v487_v20, %v447_v24  ;;  %v501_v51 = vadd.f32 %v488_v29, %v448_v36 }
 0x13e   : > { %v471_v53 = vpop.permute.xlu1 %470  ;;  %v530_v55 = vpop.permute.xlu0 %529 }
 0x13f   : > { %v485_v33 = vsel %vm484_vm1, %v471_v53, %v473_v48 }
 0x140   : > { %v498_v53 = vadd.f32 %v485_v33, %v445_v35 }
 0x142   : > { %v528_v56 = vpop.permute.xlu1 %527  ;;  %v524_v57 = vpop.permute.xlu0 %523 }
 0x143   : > { %v539_v26 = vsel %vm537_vm2, %v526_v52, %v528_v56  ;;  %v540_v22 = vsel %vm537_vm2, %v528_v56, %v530_v55  ;;  %v538_v44 = vsel %vm537_vm2, %v524_v57, %v526_v52 }
 0x144   : > { %v552_v37 = vadd.f32 %v539_v26, %v499_v27  ;;  %v553_v39 = vadd.f32 %v540_v22, %v500_v28  ;;  %v551_v57 = vadd.f32 %v538_v44, %v498_v53  ;;  %v391_v53 = vmul.f32 %v4496_v9, %v4697_v41 }
 0x146   : > { %v4703_v59 = vpop.permute.xlu1 %531  ;;  %v581_v60 = vpop.permute.xlu0 %580 }
 0x147   : > { %v541_v45 = vsel %vm537_vm2, %v530_v55, %v4703_v59 }
 0x148   : > { %v554_v15 = vadd.f32 %v541_v45, %v501_v51 }
 0x14a   : > { %v579_v61 = vpop.permute.xlu1 %578  ;;  %v4705_v62 = vpop.permute.xlu0 %584 }
 0x14b   : > { %v592_v32 = vsel %vm590_vm3, %v579_v61, %v581_v60 }
 0x14c   : > { %v605_v56 = vadd.f32 %v592_v32, %v552_v37 }
 0x14e   : > { %v583_v63 = vpop.permute.xlu1 %582  ;;  %v4707_v0 = vpop.permute.xlu0 %631 }
 0x14f   : > { %v593_v34 = vsel %vm590_vm3, %v581_v60, %v583_v63  ;;  %v594_v13 = vsel %vm590_vm3, %v583_v63, %v4705_v62 }
 0x150   : > { %v606_v60 = vadd.f32 %v593_v34, %v553_v39  ;;  %v607_v20 = vadd.f32 %v594_v13, %v554_v15 }
 0x152   : > { %v577_v1 = vpop.permute.xlu1 %576  ;;  %v4709_v2 = vpop.permute.xlu0 %635 }
 0x153   : > { %v591_v14 = vsel %vm590_vm3, %v577_v1, %v579_v61 }
 0x154   : > { %v604_v21 = vadd.f32 %v591_v14, %v551_v57 }
 0x156   : > { %v634_v3 = vpop.permute.xlu1 %633  ;;  %v630_v4 = vpop.permute.xlu0 %629 }
 0x157   : > { %v645_v47 = vsel %vm643_vm4, %v4707_v0, %v634_v3  ;;  %v646_v48 = vsel %vm643_vm4, %v634_v3, %v4709_v2  ;;  %v644_v19 = vsel %vm643_vm4, %v630_v4, %v4707_v0 }
 0x158   : > { %v658_v16 = vadd.f32 %v645_v47, %v605_v56  ;;  %v659_v17 = vadd.f32 %v646_v48, %v606_v60  ;;  %v657_v4 = vadd.f32 %v644_v19, %v604_v21 }
 0x15a   : > { %v4711_v5 = vpop.permute.xlu1 %637  ;;  %v694_v6 = vpop.permute.xlu0 %693 }
 0x15b   : > { %v647_v63 = vsel %vm643_vm4, %v4709_v2, %v4711_v5 }
 0x15c   : > { %v660_v31 = vadd.f32 %v647_v63, %v607_v20 }
 0x15e   : > { %v4713_v7 = vpop.permute.xlu1 %691  ;;  %v4715_v10 = vpop.permute.xlu0 %697 }
 0x15f   : > { %v707_v52 = vsel %vm705_vm5, %v4713_v7, %v694_v6 }
 0x162   : > { %v4717_v11 = vpop.permute.xlu1 %695  ;;  %v4719_v12 = vpop.permute.xlu0 %689 }
 0x163   : > { %v708_v55 = vsel %vm705_vm5, %v694_v6, %v4717_v11  ;;  %v721_v6 = vadd.f32 %v707_v52, %v658_v16  ;;  %v709_v23 = vsel %vm705_vm5, %v4717_v11, %v4715_v10  ;;  %v706_v0 = vsel %vm705_vm5, %v4719_v12, %v4713_v7 }
 0x164   : > { %v722_v24 = vadd.f32 %v708_v55, %v659_v17  ;;  %v723_v11 = vadd.f32 %v709_v23, %v660_v31  ;;  %v720_v32 = vadd.f32 %v706_v0, %v657_v4  ;;  %v389_v16 = vmul.f32 %v4523_v38, %v4697_v41 }
 0x165   : > { %v390_v4 = vmul.f32 %v4494_v8, %v4697_v41 }
 0x166   : > { %v750_v30 = vpop.permute.xlu1 %749  ;;  %v752_v25 = vpop.permute.xlu0 %751 }
 0x167   : > { %v765_v61 = vsel %vm763_vm6, %v750_v30, %v752_v25 }
 0x168   : > { %v779_v26 = vadd.f32 %v765_v61, %v721_v6 }
 0x16a   : > { %v754_v42 = vpop.permute.xlu1 %753  ;;  %v4743_v43 = vpop.permute.xlu0 %755 }
 0x16b   : > { %v766_v1 = vsel %vm763_vm6, %v752_v25, %v754_v42  ;;  %v767_v25 = vsel %vm763_vm6, %v754_v42, %v4743_v43 }
 0x16c   : > { %v780_v2 = vadd.f32 %v766_v1, %v722_v24  ;;  %v781_v7 = vadd.f32 %v767_v25, %v723_v11 }
 0x16e   : > { %v748_v3 = vpop.permute.xlu1 %747  ;;  %v808_v18 = vpop.permute.xlu0 %807 }
 0x16f   : > { %v764_v28 = vsel %vm763_vm6, %v748_v3, %v750_v30 }
 0x170   : > { %v778_v12 = vadd.f32 %v764_v28, %v720_v32 }
 0x172   : > { %v810_v22 = vpop.permute.xlu1 %809  ;;  %v812_v27 = vpop.permute.xlu0 %811 }
 0x173   : > { %v823_v29 = vsel %vm821_vm7, %v808_v18, %v810_v22  ;;  %v824_v33 = vsel %vm821_vm7, %v810_v22, %v812_v27 }
 0x174   : > { %v837_v34 = vadd.f32 %v823_v29, %v779_v26  ;;  %v838_v35 = vadd.f32 %v824_v33, %v780_v2 }
 0x176   : > { %v4778_v36 = vadd.f32 %v4695_v40, %v837_v34  ;;  %v4781_v37 = vadd.f32 %v4695_v40, %v838_v35  ;;  %v4783_v39 = vpop.permute.xlu1 %813  ;;  %v806_v42 = vpop.permute.xlu0 %805 }
 0x177   : > { %v825_v30 = vsel %vm821_vm7, %v812_v27, %v4783_v39  ;;  %v822_v44 = vsel %vm821_vm7, %v806_v42, %v808_v18 }
 0x178   : > { %v857_v45 = vmax.f32 %v4778_v36, 0.0  ;;  %v858_v47 = vmax.f32 %v4781_v37, 0.0  ;;  %v839_v48 = vadd.f32 %v825_v30, %v781_v7  ;;  %v836_v51 = vadd.f32 %v822_v44, %v778_v12 }
 0x17a   : > { %v4793_v56 = vadd.f32 %v4695_v40, %v839_v48  ;;  %v4796_v60 = vadd.f32 %v4695_v40, %v836_v51  ;;  %v428_v13 = vpop.permute.xlu1 %427  ;;  %v430_v14 = vpop.permute.xlu0 %429  ;;  %v4167_v52 = vpack.i.bf16 %v858_v47, %v857_v45 }
 0x17b   : > { %v451_v55 = vadd.f32 %v430_v14, %v391_v53  ;;  %v436_v9 = vsel %vm431_vm0, %v4699_v46, %v428_v13  ;;  %v437_v23 = vsel %vm431_vm0, %v428_v13, %v430_v14 }
 0x17c   : > { %v859_v57 = vmax.f32 %v4793_v56, 0.0  ;;  %v856_v15 = vmax.f32 %v4796_v60, 0.0  ;;  %4168 = vrot.lane.b32.xlu1 %v4167_v52, %s4335_s25  ;;  %v449_v61 = vadd.f32 %v436_v9, %v389_v16  ;;  %v450_v26 = vadd.f32 %v437_v23, %v390_v4  ;;  %v946_v16 = vld [vmem:[%s6159_s3 + $0x8] sm:$0xff]  ;;  %v955_v4 = vld [vmem:[%s6159_s3 + $0x50] sm:$0xff] }
 0x17e   : > { %v481_v17 = vpop.permute.xlu1 %480  ;;  %v483_v3 = vpop.permute.xlu0 %482  ;;  %v4172_v18 = vpack.i.bf16 %v856_v15, %v859_v57 }
 0x17f   : > { %v489_v19 = vsel %vm484_vm1, %v4701_v49, %v481_v17  ;;  %v504_v63 = vadd.f32 %v483_v3, %v451_v55 }
 0x180   : > { %703 = vrot.lane.b32.xlu1 %v4550_v50, %s4340_s27  ;;  %4173 = vrot.lane.b32.xlu0 %v4172_v18, %s4335_s25  ;;  %v502_v46 = vadd.f32 %v489_v19, %v449_v61  ;;  %v947_v18 = vld [vmem:[%s6159_s3 + $0x10] sm:$0xff]  ;;  %v950_v19 = vld [vmem:[%s6159_s3 + $0x28] sm:$0xff]  ;;  %s4348_s27 = smov 95  }
 0x182   : > { %v534_v1 = vpop.permute.xlu1 %533  ;;  %v536_v38 = vpop.permute.xlu0 %535 }
 0x183   : > { %v542_v20 = vsel %vm537_vm2, %v4703_v59, %v534_v1  ;;  %v557_v21 = vadd.f32 %v536_v38, %v504_v63  ;;  %v490_v59 = vsel %vm484_vm1, %v481_v17, %v483_v3  ;;  %v543_v22 = vsel %vm537_vm2, %v534_v1, %v536_v38  ;;  %v948_v17 = vld [vmem:[%s6159_s3 + $0x18] sm:$0xff] }
 0x184   : > { %v555_v6 = vadd.f32 %v542_v20, %v502_v46  ;;  %761 = vrot.lane.b32.xlu0 %v4562_v54, %s4341_s21  ;;  %v503_v25 = vadd.f32 %v490_v59, %v450_v26  ;;  %v3642_v3 = vpack.c.bf16 %v948_v17, %v946_v16  ;;  %v952_v63 = vld [vmem:[%s6159_s3 + $0x38] sm:$0xff]  ;;  %v949_v20 = vld [vmem:[%s6159_s3 + $0x20] sm:$0xff]  ;;  %v975_v16 = vld [vmem:[%s6159_s3 + $0xf0] sm:$0xff] }
 0x185   : > { %v3646_v38 = vpack.c.bf16 %v952_v63, %v950_v19  ;;  %v960_v59 = vld [vmem:[%s6159_s3 + $0x78] sm:$0xff]  ;;  %v978_v17 = vld [vmem:[%s6159_s3 + $0x108] sm:$0xff]  ;;  %v977_v19 = vld [vmem:[%s6159_s3 + $0x100] sm:$0xff] }
 0x186   : > { %v587_v24 = vpop.permute.xlu1 %586  ;;  %v589_v49 = vpop.permute.xlu0 %588  ;;  %v556_v28 = vadd.f32 %v543_v22, %v503_v25  ;;  %3643 = vmatprep.subr.bf16.mxu0 %v3642_v3  ;;  %v959_v22 = vld [vmem:[%s6159_s3 + $0x70] sm:$0xff]  ;;  %v962_v25 = vld [vmem:[%s6159_s3 + $0x88] sm:$0xff] }
 0x187   : > { %v595_v50 = vsel %vm590_vm3, %v4705_v62, %v587_v24  ;;  %v610_v0 = vadd.f32 %v589_v49, %v557_v21  ;;  %v596_v62 = vsel %vm590_vm3, %v587_v24, %v589_v49  ;;  %v951_v21 = vld [vmem:[%s6159_s3 + $0x30] sm:$0xff]  ;;  %v956_v24 = vld [vmem:[%s6159_s3 + $0x58] sm:$0xff] }
 0x188   : > { %v608_v31 = vadd.f32 %v595_v50, %v555_v6  ;;  %819 = vrot.lane.b32.xlu0 %v4570_v58, %s4342_s29  ;;  %v609_v41 = vadd.f32 %v596_v62, %v556_v28  ;;  %v954_v6 = vld [vmem:[%s6159_s3 + $0x48] sm:$0xff]  ;;  %v3648_v23 = vpack.c.bf16 %v951_v21, %v949_v20  ;;  %v964_v62 = vld [vmem:[%s6159_s3 + $0x98] sm:$0xff]  ;;  %v979_v63 = vld [vmem:[%s6159_s3 + $0x110] sm:$0xff] }
 0x189   : > { %v3650_v50 = vpack.c.bf16 %v956_v24, %v954_v6  ;;  %v3676_v20 = vpack.c.bf16 %v979_v63, %v977_v19  ;;  %v981_v6 = vld [vmem:[%s6159_s3 + $0x120] sm:$0xff]  ;;  %v983_v24 = vld [vmem:[%s6159_s3 + $0x130] sm:$0xff] }
 0x18a   : > { %v640_v2 = vpop.permute.xlu1 %639  ;;  %v642_v54 = vpop.permute.xlu0 %641 }
 0x18b   : > { %v4831_v27 = vadd.f32 %v642_v54, %v610_v0  ;;  %v648_v8 = vsel %vm643_vm4, %v4711_v5, %v640_v2  ;;  %v649_v58 = vsel %vm643_vm4, %v640_v2, %v642_v54  ;;  %v953_v0 = vld [vmem:[%s6159_s3 + $0x40] sm:$0xff] }
 0x18c   : > { %v661_v34 = vadd.f32 %v648_v8, %v608_v31  ;;  %v662_v35 = vadd.f32 %v649_v58, %v609_v41  ;;  %v958_v31 = vld [vmem:[%s6159_s3 + $0x68] sm:$0xff]  ;;  %v3652_v26 = vpack.c.bf16 %v955_v4, %v953_v0  ;;  %v957_v54 = vld [vmem:[%s6159_s3 + $0x60] sm:$0xff]  ;;  %v963_v58 = vld [vmem:[%s6159_s3 + $0x90] sm:$0xff] }
 0x18d   : > { %v3654_v2 = vpack.c.bf16 %v960_v59, %v958_v31  ;;  %v3656_v28 = vpack.c.bf16 %v959_v22, %v957_v54  ;;  %v961_v8 = vld [vmem:[%s6159_s3 + $0x80] sm:$0xff]  ;;  %v966_v41 = vld [vmem:[%s6159_s3 + $0xa8] sm:$0xff]  ;;  %v987_v31 = vld [vmem:[%s6159_s3 + $0x150] sm:$0xff] }
 0x18e   : > { %v700_v29 = vpop.permute.xlu1 %699  ;;  %v4834_v33 = vpop.permute.xlu0 %701  ;;  %v985_v4 = vld [vmem:[%s6159_s3 + $0x140] sm:$0xff]  ;;  %v990_v59 = vld [vmem:[%s6159_s3 + $0x168] sm:$0xff] }
 0x18f   : > { %v710_v11 = vsel %vm705_vm5, %v4715_v10, %v700_v29  ;;  %v711_v32 = vsel %vm705_vm5, %v700_v29, %v4834_v33  ;;  %v3658_v29 = vpack.c.bf16 %v964_v62, %v962_v25  ;;  %v989_v22 = vld [vmem:[%s6159_s3 + $0x160] sm:$0xff]  ;;  %v991_v25 = vld [vmem:[%s6159_s3 + $0x170] sm:$0xff]  ;;  %v994_v62 = vld [vmem:[%s6159_s3 + $0x188] sm:$0xff] }
 0x190   : > { %v724_v30 = vadd.f32 %v710_v11, %v661_v34  ;;  %v725_v44 = vadd.f32 %v711_v32, %v662_v35  ;;  %v968_v11 = vld [vmem:[%s6159_s3 + $0xb8] sm:$0xff]  ;;  %v3660_v32 = vpack.c.bf16 %v963_v58, %v961_v8  ;;  %v965_v35 = vld [vmem:[%s6159_s3 + $0xa0] sm:$0xff] }
 0x191   : > { %v3662_v34 = vpack.c.bf16 %v968_v11, %v966_v41  ;;  %v993_v58 = vld [vmem:[%s6159_s3 + $0x180] sm:$0xff]  ;;  %v995_v41 = vld [vmem:[%s6159_s3 + $0x190] sm:$0xff]  ;;  %v998_v11 = vld [vmem:[%s6159_s3 + $0x1a8] sm:$0xff] }
 0x192   : > { %v758_v7 = vpop.permute.xlu1 %757  ;;  %v4843_v12 = vpop.permute.xlu0 %759 }
 0x193   : > { %v768_v42 = vsel %vm763_vm6, %v4743_v43, %v758_v7  ;;  %v769_v5 = vsel %vm763_vm6, %v758_v7, %v4843_v12  ;;  %v967_v7 = vld [vmem:[%s6159_s3 + $0xb0] sm:$0xff] }
 0x194   : > { %v782_v48 = vadd.f32 %v768_v42, %v724_v30  ;;  %v783_v51 = vadd.f32 %v769_v5, %v725_v44  ;;  %v970_v42 = vld [vmem:[%s6159_s3 + $0xc8] sm:$0xff]  ;;  %v972_v5 = vld [vmem:[%s6159_s3 + $0xd8] sm:$0xff]  ;;  %v3664_v30 = vpack.c.bf16 %v967_v7, %v965_v35  ;;  %v997_v7 = vld [vmem:[%s6159_s3 + $0x1a0] sm:$0xff] }
 0x195   : > { %v3666_v44 = vpack.c.bf16 %v972_v5, %v970_v42  ;;  %v999_v42 = vld [vmem:[%s6159_s3 + $0x1b0] sm:$0xff]  ;;  %v1002_v5 = vld [vmem:[%s6159_s3 + $0x1c8] sm:$0xff] }
 0x196   : > { %v816_v53 = vpop.permute.xlu1 %815  ;;  %v4849_v10 = vpop.permute.xlu0 %817 }
 0x197   : > { %v826_v13 = vsel %vm821_vm7, %v4783_v39, %v816_v53  ;;  %v827_v14 = vsel %vm821_vm7, %v816_v53, %v4849_v10  ;;  %v945_v39 = vld [vmem:[%s6159_s3] sm:$0xff]  ;;  %v974_v53 = vld [vmem:[%s6159_s3 + $0xe8] sm:$0xff] }
 0x198   : > { %v840_v52 = vadd.f32 %v826_v13, %v782_v48  ;;  %v841_v55 = vadd.f32 %v827_v14, %v783_v51  ;;  %v3644_v1 = vpack.c.bf16 %v947_v18, %v945_v39  ;;  %v969_v48 = vld [vmem:[%s6159_s3 + $0xc0] sm:$0xff]  ;;  %v971_v51 = vld [vmem:[%s6159_s3 + $0xd0] sm:$0xff]  ;;  %v976_v13 = vld [vmem:[%s6159_s3 + $0xf8] sm:$0xff] }
 0x199   : > { %v3668_v14 = vpack.c.bf16 %v971_v51, %v969_v48  ;;  %v980_v39 = vld [vmem:[%s6159_s3 + $0x118] sm:$0xff]  ;;  %v1001_v51 = vld [vmem:[%s6159_s3 + $0x1c0] sm:$0xff] }
 0x19a   : > { %v4856_v43 = vadd.f32 %v4695_v40, %v840_v52  ;;  %v4859_v9 = vadd.f32 %v4695_v40, %v841_v55  ;;  %3645 = vmatpush1.bf16.msra.mxu0 %v3644_v1  ;;  %v3670_v52 = vpack.c.bf16 %v976_v13, %v974_v53  ;;  %v973_v55 = vld [vmem:[%s6159_s3 + $0xe0] sm:$0xff]  ;;  %v3674_v18 = vpack.c.bf16 %v980_v39, %v978_v17  ;;  %v982_v1 = vld [vmem:[%s6159_s3 + $0x128] sm:$0xff]  ;;  %v1003_v53 = vld [vmem:[%s6159_s3 + $0x1d0] sm:$0xff] }
 0x19b   : > { %3647 = vmatprep.subr.bf16.mxu0 %v3646_v38  ;;  %v3672_v3 = vpack.c.bf16 %v975_v16, %v973_v55  ;;  %v984_v38 = vld [vmem:[%s6159_s3 + $0x138] sm:$0xff]  ;;  %v3700_v13 = vpack.c.bf16 %v1003_v53, %v1001_v51  ;;  %v1005_v55 = vld [vmem:[%s6159_s3 + $0x1e0] sm:$0xff]  ;;  %v1007_v39 = vld [vmem:[%s6159_s3 + $0x1f0] sm:$0xff] }
 0x19c   : > { %v860_v61 = vmax.f32 %v4856_v43, 0.0  ;;  %v861_v46 = vmax.f32 %v4859_v9, 0.0  ;;  %v3678_v21 = vpack.c.bf16 %v984_v38, %v982_v1  ;;  %v3704_v19 = vpack.c.bf16 %v1007_v39, %v1005_v55  ;;  %v1010_v38 = vld [vmem:[%s6159_s3 + $0x208] sm:$0xff]  ;;  %v1139_v43 = vld [vmem:[%s6159_s3 + $0x610] sm:$0xff]  ;;  %v1009_v51 = vld [vmem:[%s6159_s3 + $0x200] sm:$0xff] }
 0x19d   : > { %v1011_v53 = vld [vmem:[%s6159_s3 + $0x210] sm:$0xff]  ;;  %v1024_v9 = vld [vmem:[%s6159_s3 + $0x278] sm:$0xff] }
 0x19e   : > { %v4182_v49 = vpack.i.bf16 %v861_v46, %v860_v61  ;;  %3649 = vmatpush1.bf16.msra.mxu0 %v3648_v23  ;;  %v988_v23 = vld [vmem:[%s6159_s3 + $0x158] sm:$0xff]  ;;  %v3708_v39 = vpack.c.bf16 %v1011_v53, %v1009_v51 }
 0x19f   : > { %3651 = vmatprep.subr.bf16.mxu0 %v3650_v50  ;;  %v3680_v50 = vpack.c.bf16 %v983_v24, %v981_v6 }
 0x1a0   : > { %4183 = vrot.lane.b32.xlu0 %v4182_v49, %s4335_s25  ;;  %v986_v49 = vld [vmem:[%s6159_s3 + $0x148] sm:$0xff] }
 0x1a1   : > { %v3682_v0 = vpack.c.bf16 %v988_v23, %v986_v49 }
 0x1a2   : > { %3653 = vmatpush1.bf16.msra.mxu0 %v3652_v26  ;;  %v992_v26 = vld [vmem:[%s6159_s3 + $0x178] sm:$0xff] }
 0x1a3   : > { %3655 = vmatprep.subr.bf16.mxu0 %v3654_v2  ;;  %v3684_v2 = vpack.c.bf16 %v987_v31, %v985_v4  ;;  %v3686_v54 = vpack.c.bf16 %v992_v26, %v990_v59 }
 0x1a6   : > { %3657 = vmatpush1.bf16.msra.mxu0 %v3656_v28  ;;  %v996_v28 = vld [vmem:[%s6159_s3 + $0x198] sm:$0xff] }
 0x1a7   : > { %3659 = vmatprep.subr.bf16.mxu0 %v3658_v29  ;;  %v3688_v29 = vpack.c.bf16 %v991_v25, %v989_v22  ;;  %v3690_v8 = vpack.c.bf16 %v996_v28, %v994_v62 }
 0x1aa   : > { %3661 = vmatpush1.bf16.msra.mxu0 %v3660_v32  ;;  %v1000_v32 = vld [vmem:[%s6159_s3 + $0x1b8] sm:$0xff] }
 0x1ab   : > { %3663 = vmatprep.subr.bf16.mxu0 %v3662_v34  ;;  %v3692_v34 = vpack.c.bf16 %v995_v41, %v993_v58  ;;  %v3694_v35 = vpack.c.bf16 %v1000_v32, %v998_v11  ;;  %v1142_v58 = vld [vmem:[%s6159_s3 + $0x628] sm:$0xff]  ;;  %v1144_v41 = vld [vmem:[%s6159_s3 + $0x638] sm:$0xff]  ;;  %v1141_v32 = vld [vmem:[%s6159_s3 + $0x620] sm:$0xff] }
 0x1ac   : > { %v3838_v11 = vpack.c.bf16 %v1144_v41, %v1142_v58 }
 0x1ae   : > { %3665 = vmatpush1.bf16.msra.mxu0 %v3664_v30  ;;  %v1004_v30 = vld [vmem:[%s6159_s3 + $0x1d8] sm:$0xff] }
 0x1af   : > { %3667 = vmatprep.subr.bf16.mxu0 %v3666_v44  ;;  %v3696_v44 = vpack.c.bf16 %v999_v42, %v997_v7  ;;  %v3698_v48 = vpack.c.bf16 %v1004_v30, %v1002_v5  ;;  %v1146_v7 = vld [vmem:[%s6159_s3 + $0x648] sm:$0x7f]  ;;  %v1145_v5 = vld [vmem:[%s6159_s3 + $0x640] sm:$0x7f] }
 0x1b2   : > { %3669 = vmatpush1.bf16.msra.mxu0 %v3668_v14  ;;  %v1006_v14 = vld [vmem:[%s6159_s3 + $0x1e8] sm:$0xff] }
 0x1b3   : > { %3671 = vmatprep.subr.bf16.mxu0 %v3670_v52  ;;  %v1008_v52 = vld [vmem:[%s6159_s3 + $0x1f8] sm:$0xff] }
 0x1b4   : > { %v3702_v17 = vpack.c.bf16 %v1008_v52, %v1006_v14  ;;  %v1014_v14 = vld [vmem:[%s6159_s3 + $0x228] sm:$0xff]  ;;  %v1016_v52 = vld [vmem:[%s6159_s3 + $0x238] sm:$0xff] }
 0x1b6   : > { %3673 = vmatpush1.bf16.msra.mxu0 %v3672_v3 }
 0x1b7   : > { %3675 = vmatprep.subr.bf16.mxu0 %v3674_v18 }
 0x1ba   : > { %3677 = vmatpush1.bf16.msra.mxu0 %v3676_v20  ;;  %v1012_v20 = vld [vmem:[%s6159_s3 + $0x218] sm:$0xff] }
 0x1bb   : > { %3679 = vmatprep.subr.bf16.mxu0 %v3678_v21  ;;  %v3706_v24 = vpack.c.bf16 %v1012_v20, %v1010_v38  ;;  %v1020_v38 = vld [vmem:[%s6159_s3 + $0x258] sm:$0xff] }
 0x1be   : > { %3681 = vmatpush1.bf16.msra.mxu0 %v3680_v50 }
 0x1bf   : > { %3683 = vmatprep.subr.bf16.mxu0 %v3682_v0 }
 0x1c2   : > { %3685 = vmatpush1.bf16.msra.mxu0 %v3684_v2 }
 0x1c3   : > { %3687 = vmatprep.subr.bf16.mxu0 %v3686_v54 }
 0x1c6   : > { %3689 = vmatpush1.bf16.msra.mxu0 %v3688_v29 }
 0x1c7   : > { %3691 = vmatprep.subr.bf16.mxu0 %v3690_v8  ;;  %v1140_v8 = vld [vmem:[%s6159_s3 + $0x618] sm:$0xff] }
 0x1ca   : > { %3693 = vmatpush1.bf16.msra.mxu0 %v3692_v34  ;;  %v1143_v34 = vld [vmem:[%s6159_s3 + $0x630] sm:$0xff] }
 0x1cb   : > { %3695 = vmatprep.subr.bf16.mxu0 %v3694_v35  ;;  %v3840_v35 = vpack.c.bf16 %v1143_v34, %v1141_v32  ;;  %v1039_v32 = vld [vmem:[%s6159_s3 + $0x2f0] sm:$0xff]  ;;  %v1042_v34 = vld [vmem:[%s6159_s3 + $0x308] sm:$0xff] }
 0x1ce   : > { %3697 = vmatpush1.bf16.msra.mxu0 %v3696_v44 }
 0x1cf   : > { %3699 = vmatprep.subr.bf16.mxu0 %v3698_v48  ;;  %v4343_v48 = vmov 0.0  }
 0x1d0   : > { %1435 = vmatprep.mubr.f32.mxu1 %v4343_v48 }
 0x1d2   : > { %3701 = vmatpush1.bf16.msra.mxu0 %v3700_v13 }
 0x1d3   : > { %3703 = vmatprep.subr.bf16.mxu0 %v3702_v17 }
 0x1d6   : > { %3705 = vmatpush1.bf16.msra.mxu0 %v3704_v19  ;;  %v1013_v19 = vld [vmem:[%s6159_s3 + $0x220] sm:$0xff] }
 0x1d7   : > { %3707 = vmatprep.subr.bf16.mxu0 %v3706_v24 }
 0x1ee   : > { %v4169_v16 = vpop.permute.xlu1 %4168 }
 0x1ef   : > { %v4171_v3 = vunpack.i.h.bf16 %v4169_v16  ;;  %v4170_v18 = vunpack.i.l.bf16 %v4169_v16 }
 0x1f1   : > { %v885_v21 = vsel %vm431_vm0, %v4170_v18, %v4171_v3 }
 0x1f2   : > { %v704_v63 = vpop.permute.xlu1 %703  ;;  %v4174_v1 = vpop.permute.xlu0 %4173  ;;  %v898_v4 = vmax.f32 %v857_v45, %v885_v21 }
 0x1f3   : > { %v4175_v6 = vunpack.i.l.bf16 %v4174_v1  ;;  %v712_v49 = vsel %vm705_vm5, %v4834_v33, %v704_v63  ;;  %v4176_v23 = vunpack.i.h.bf16 %v4174_v1  ;;  %v1015_v63 = vld [vmem:[%s6159_s3 + $0x230] sm:$0xff]  ;;  %v1018_v1 = vld [vmem:[%s6159_s3 + $0x248] sm:$0xff]  ;;  %vm1880_vm5 = vcmask 1040384  }
 0x1f4   : > { %v726_v26 = vadd.f32 %v712_v49, %v4831_v27  ;;  %v3712_v24 = vpack.c.bf16 %v1015_v63, %v1013_v19  ;;  %v1047_v19 = vld [vmem:[%s6159_s3 + $0x330] sm:$0xff]  ;;  %v1050_v63 = vld [vmem:[%s6159_s3 + $0x348] sm:$0xff] }
 0x1f5   : > { %v886_v50 = vsel %vm431_vm0, %v4171_v3, %v4175_v6  ;;  %v884_v33 = vsel %vm431_vm0, %v4176_v23, %v4170_v18  ;;  %v3710_v18 = vpack.c.bf16 %v1016_v52, %v1014_v14  ;;  %v3714_v23 = vpack.c.bf16 %v1020_v38, %v1018_v1  ;;  %v1043_v14 = vld [vmem:[%s6159_s3 + $0x310] sm:$0xff] }
 0x1f6   : > { %v762_v0 = vpop.permute.xlu0 %761  ;;  %v5074_v31 = vmax.f32 %v858_v47, %v886_v50  ;;  %v897_v37 = vmax.f32 %v856_v15, %v884_v33  ;;  %v1138_v15 = vld [vmem:[%s6159_s3 + $0x608] sm:$0xff]  ;;  %v1017_v50 = vld [vmem:[%s6159_s3 + $0x240] sm:$0xff] }
 0x1f7   : > { %v770_v59 = vsel %vm763_vm6, %v4843_v12, %v762_v0  ;;  %v3834_v56 = vpack.c.bf16 %v1140_v8, %v1138_v15  ;;  %v1019_v0 = vld [vmem:[%s6159_s3 + $0x250] sm:$0xff]  ;;  %v1026_v33 = vld [vmem:[%s6159_s3 + $0x288] sm:$0xff]  ;;  %vm1876_vm6 = vcmask 400384  }
 0x1f8   : > { %v4177_v2 = vpack.i.bf16 %v5074_v31, %v898_v4  ;;  %v784_v54 = vadd.f32 %v770_v59, %v726_v26  ;;  %v1021_v26 = vld [vmem:[%s6159_s3 + $0x260] sm:$0xff] }
 0x1f9   : > { %3835 = vmatprep.subr.bf16.mxu1 %v3834_v56  ;;  %v1033_v56 = vld [vmem:[%s6159_s3 + $0x2c0] sm:$0xff] }
 0x1fa   : > { %v820_v22 = vpop.permute.xlu0 %819  ;;  %4178 = vrot.lane.b32.xlu1 %v4177_v2, %s6180_s14  ;;  %v1023_v2 = vld [vmem:[%s6159_s3 + $0x270] sm:$0xff] }
 0x1fb   : > { %v828_v36 = vsel %vm821_vm7, %v4849_v10, %v820_v22  ;;  %v3720_v22 = vpack.c.bf16 %v1023_v2, %v1021_v26  ;;  %vm3110_vm7 = vcmask 73728  }
 0x1fc   : > { %v842_v45 = vadd.f32 %v828_v36, %v784_v54  ;;  %v1028_v54 = vld [vmem:[%s6159_s3 + $0x298] sm:$0xff] }
 0x1fd   : > { %v3722_v36 = vpack.c.bf16 %v1028_v54, %v1026_v33  ;;  %v1057_v33 = vld [vmem:[%s6159_s3 + $0x380] sm:$0xff]  ;;  %v1059_v54 = vld [vmem:[%s6159_s3 + $0x390] sm:$0xff] }
 0x1fe   : > { %911 = vrot.lane.b32.xlu1 %v897_v37, %s6180_s14  ;;  %v855_v47 = vadd.f32 %v4695_v40, %v842_v45  ;;  %v1025_v45 = vld [vmem:[%s6159_s3 + $0x280] sm:$0xff] }
 0x200   : > { %v862_v27 = vmax.f32 %v855_v47, 0.0  ;;  %v1030_v47 = vld [vmem:[%s6159_s3 + $0x2a8] sm:$0xff] }
 0x202   : > { %882 = vrot.lane.b32.xlu0 %v862_v27, %s4335_s25 }
 0x212   : > { %v4184_v12 = vpop.permute.xlu0 %4183 }
 0x213   : > { %v4186_v25 = vunpack.i.h.bf16 %v4184_v12  ;;  %v4185_v62 = vunpack.i.l.bf16 %v4184_v12 }
 0x215   : > { %v887_v28 = vsel %vm431_vm0, %v4175_v6, %v4185_v62  ;;  %v888_v29 = vsel %vm431_vm0, %v4185_v62, %v4186_v25  ;;  %v1029_v62 = vld [vmem:[%s6159_s3 + $0x2a0] sm:$0xff] }
 0x216   : > { %v5093_v10 = vmax.f32 %v859_v57, %v887_v28  ;;  %v5097_v60 = vmax.f32 %v860_v61, %v888_v29  ;;  %v1137_v57 = vld [vmem:[%s6159_s3 + $0x600] sm:$0xff]  ;;  %v1031_v28 = vld [vmem:[%s6159_s3 + $0x2b0] sm:$0xff]  ;;  %v1034_v29 = vld [vmem:[%s6159_s3 + $0x2c8] sm:$0xff] }
 0x217   : > { %v3836_v61 = vpack.c.bf16 %v1139_v43, %v1137_v57  ;;  %v3728_v15 = vpack.c.bf16 %v1031_v28, %v1029_v62  ;;  %v1035_v57 = vld [vmem:[%s6159_s3 + $0x2d0] sm:$0xff]  ;;  %v1038_v43 = vld [vmem:[%s6159_s3 + $0x2e8] sm:$0xff] }
 0x218   : > { %v4187_v40 = vpack.i.bf16 %v5097_v60, %v5093_v10  ;;  %v3732_v58 = vpack.c.bf16 %v1035_v57, %v1033_v56 }
 0x219   : > { %3837 = vmatpush1.bf16.msra.mxu1 %v3836_v61  ;;  %v1040_v61 = vld [vmem:[%s6159_s3 + $0x2f8] sm:$0xff] }
 0x21a   : > { %4188 = vrot.lane.b32.xlu1 %v4187_v40, %s6180_s14  ;;  %3839 = vmatprep.subr.bf16.mxu1 %v3838_v11  ;;  %v1036_v40 = vld [vmem:[%s6159_s3 + $0x2d8] sm:$0xff]  ;;  %v3734_v41 = vpack.c.bf16 %v1040_v61, %v1038_v43  ;;  %v1037_v11 = vld [vmem:[%s6159_s3 + $0x2e0] sm:$0xff]  ;;  %v1071_v61 = vld [vmem:[%s6159_s3 + $0x3f0] sm:$0xff] }
 0x21b   : > { %v3730_v8 = vpack.c.bf16 %v1036_v40, %v1034_v29  ;;  %v3736_v51 = vpack.c.bf16 %v1039_v32, %v1037_v11  ;;  %v1065_v29 = vld [vmem:[%s6159_s3 + $0x3c0] sm:$0xff]  ;;  %v1067_v40 = vld [vmem:[%s6159_s3 + $0x3d0] sm:$0xff] }
 0x21c   : > { %v3764_v56 = vpack.c.bf16 %v1067_v40, %v1065_v29  ;;  %v1069_v43 = vld [vmem:[%s6159_s3 + $0x3e0] sm:$0xff]  ;;  %v1106_v29 = vld [vmem:[%s6159_s3 + $0x508] sm:$0xff]  ;;  %v1108_v40 = vld [vmem:[%s6159_s3 + $0x518] sm:$0xff] }
 0x21d   : > { %3841 = vmatpush1.bf16.msra.mxu1 %v3840_v35  ;;  %v1044_v35 = vld [vmem:[%s6159_s3 + $0x318] sm:$0xff]  ;;  %v3768_v11 = vpack.c.bf16 %v1071_v61, %v1069_v43  ;;  %v1110_v43 = vld [vmem:[%s6159_s3 + $0x528] sm:$0xff] }
 0x21e   : > { %3199 = vmatprep.subr.msk.mxu1 %vm1151_vm8, %v1146_v7  ;;  %v3738_v53 = vpack.c.bf16 %v1044_v35, %v1042_v34  ;;  %v1073_v34 = vld [vmem:[%s6159_s3 + $0x400] sm:$0xff]  ;;  %v1075_v35 = vld [vmem:[%s6159_s3 + $0x410] sm:$0xff]  ;;  %v1112_v61 = vld [vmem:[%s6159_s3 + $0x538] sm:$0xff] }
 0x221   : > { %3200 = vmatpush1.msk.msra.mxu1 %vm1151_vm8, %v1145_v5 }
 0x26c   : > { %v5129_v42 = vpop.permute.xlu1 %4178 }
 0x26d   : > { %v4181_v30 = vunpack.i.h.bf16 %v5129_v42  ;;  %v4180_v44 = vunpack.i.l.bf16 %v5129_v42  ;;  %v1077_v42 = vld [vmem:[%s6159_s3 + $0x420] sm:$0xff] }
 0x26f   : > { %v926_v13 = vsel %vm537_vm2, %v4180_v44, %v4181_v30 }
 0x270   : > { %v912_v55 = vpop.permute.xlu1 %911  ;;  %v939_v16 = vmax.f32 %v898_v4, %v926_v13  ;;  %v1022_v4 = vld [vmem:[%s6159_s3 + $0x268] sm:$0xff]  ;;  %v1041_v13 = vld [vmem:[%s6159_s3 + $0x300] sm:$0xff] }
 0x271   : > { %v925_v17 = vsel %vm537_vm2, %v912_v55, %v4180_v44  ;;  %v3718_v59 = vpack.c.bf16 %v1024_v9, %v1022_v4  ;;  %v1046_v55 = vld [vmem:[%s6159_s3 + $0x328] sm:$0xff]  ;;  %v1053_v4 = vld [vmem:[%s6159_s3 + $0x360] sm:$0xff]  ;;  %v1055_v9 = vld [vmem:[%s6159_s3 + $0x370] sm:$0xff] }
 0x272   : > { %v938_v3 = vmax.f32 %v897_v37, %v925_v17  ;;  %1222 = vmatprep.mubr.f32.mxu0 %v939_v16  ;;  %v1027_v37 = vld [vmem:[%s6159_s3 + $0x290] sm:$0xff]  ;;  %v1048_v16 = vld [vmem:[%s6159_s3 + $0x338] sm:$0xff]  ;;  %v3752_v26 = vpack.c.bf16 %v1055_v9, %v1053_v4  ;;  %v1094_v4 = vld [vmem:[%s6159_s3 + $0x4a8] sm:$0xff] }
 0x273   : > { %v3724_v12 = vpack.c.bf16 %v1027_v37, %v1025_v45  ;;  %v3756_v45 = vpack.c.bf16 %v1059_v54, %v1057_v33  ;;  %v1096_v9 = vld [vmem:[%s6159_s3 + $0x4b8] sm:$0xff]  ;;  %v1098_v33 = vld [vmem:[%s6159_s3 + $0x4c8] sm:$0xff] }
 0x274   : > { %v883_v20 = vpop.permute.xlu0 %882  ;;  %1223 = vmatmul.mubr.f32.vlgmr.msra.gmra.mrb[0].mxu0 %v938_v3  ;;  %v3742_v3 = vpack.c.bf16 %v1048_v16, %v1046_v55  ;;  %v1084_v16 = vld [vmem:[%s6159_s3 + $0x458] sm:$0xff] }
 0x275   : > { %v889_v21 = vsel %vm431_vm0, %v4186_v25, %v883_v20  ;;  %v5166_v6 = vmax.f32 %v862_v27, %v883_v20  ;;  %3709 = vmatpush1.bf16.msra.mxu0 %v3708_v39  ;;  %v1032_v27 = vld [vmem:[%s6159_s3 + $0x2b8] sm:$0xff]  ;;  %v3740_v39 = vpack.c.bf16 %v1043_v14, %v1041_v13  ;;  %v1049_v20 = vld [vmem:[%s6159_s3 + $0x340] sm:$0xff]  ;;  %v3772_v14 = vpack.c.bf16 %v1075_v35, %v1073_v34  ;;  %v1114_v34 = vld [vmem:[%s6159_s3 + $0x548] sm:$0xff] }
 0x276   : > { %v5170_v49 = vmax.f32 %v861_v46, %v889_v21  ;;  %3711 = vmatprep.subr.bf16.mxu0 %v3710_v18  ;;  %v3716_v46 = vpack.c.bf16 %v1019_v0, %v1017_v50  ;;  %v3726_v25 = vpack.c.bf16 %v1032_v27, %v1030_v47  ;;  %v1045_v18 = vld [vmem:[%s6159_s3 + $0x320] sm:$0xff]  ;;  %v1051_v21 = vld [vmem:[%s6159_s3 + $0x350] sm:$0xff]  ;;  %v1080_v13 = vld [vmem:[%s6159_s3 + $0x438] sm:$0xff] }
 0x277   : > { %923 = vrot.lane.b32.xlu0 %v5166_v6, %s6180_s14  ;;  %v3744_v1 = vpack.c.bf16 %v1047_v19, %v1045_v18  ;;  %v3748_v50 = vpack.c.bf16 %v1051_v21, %v1049_v20  ;;  %v1061_v47 = vld [vmem:[%s6159_s3 + $0x3a0] sm:$0xff]  ;;  %v1063_v27 = vld [vmem:[%s6159_s3 + $0x3b0] sm:$0xff]  ;;  %v1086_v18 = vld [vmem:[%s6159_s3 + $0x468] sm:$0xff] }
 0x278   : > { %921 = vrot.lane.b32.xlu1 %v5170_v49, %s6180_s14  ;;  %v3760_v62 = vpack.c.bf16 %v1063_v27, %v1061_v47  ;;  %v1088_v19 = vld [vmem:[%s6159_s3 + $0x478] sm:$0xff]  ;;  %v1090_v20 = vld [vmem:[%s6159_s3 + $0x488] sm:$0xff]  ;;  %s6181_s14 = smov 126  }
 0x279   : > { %3713 = vmatpush1.bf16.msra.mxu0 %v3712_v24  ;;  %v1054_v24 = vld [vmem:[%s6159_s3 + $0x368] sm:$0xff]  ;;  %v1092_v21 = vld [vmem:[%s6159_s3 + $0x498] sm:$0xff] }
 0x27a   : > { %3715 = vmatprep.subr.bf16.mxu0 %v3714_v23  ;;  %v1056_v23 = vld [vmem:[%s6159_s3 + $0x378] sm:$0xff]  ;;  %v1102_v47 = vld [vmem:[%s6159_s3 + $0x4e8] sm:$0xff] }
 0x27b   : > { %v3750_v0 = vpack.c.bf16 %v1056_v23, %v1054_v24  ;;  %v3786_v23 = vpack.c.bf16 %v1092_v21, %v1090_v20  ;;  %v1100_v54 = vld [vmem:[%s6159_s3 + $0x4d8] sm:$0xff]  ;;  %v1125_v20 = vld [vmem:[%s6159_s3 + $0x5a0] sm:$0xff]  ;;  %v1127_v21 = vld [vmem:[%s6159_s3 + $0x5b0] sm:$0xff] }
 0x27c   : > { %v1104_v27 = vld [vmem:[%s6159_s3 + $0x4f8] sm:$0xff] }
 0x27d   : > { %3717 = vmatpush1.bf16.msra.mxu0 %v3716_v46  ;;  %v1058_v46 = vld [vmem:[%s6159_s3 + $0x388] sm:$0xff]  ;;  %v1116_v35 = vld [vmem:[%s6159_s3 + $0x558] sm:$0xff] }
 0x27e   : > { %3719 = vmatprep.subr.bf16.mxu0 %v3718_v59  ;;  %v1060_v59 = vld [vmem:[%s6159_s3 + $0x398] sm:$0xff] }
 0x27f   : > { %v3754_v2 = vpack.c.bf16 %v1060_v59, %v1058_v46  ;;  %v3790_v59 = vpack.c.bf16 %v1096_v9, %v1094_v4  ;;  %v1129_v4 = vld [vmem:[%s6159_s3 + $0x5c0] sm:$0xff]  ;;  %v1131_v9 = vld [vmem:[%s6159_s3 + $0x5d0] sm:$0xff] }
 0x281   : > { %3721 = vmatpush1.bf16.msra.mxu0 %v3720_v22  ;;  %v1062_v22 = vld [vmem:[%s6159_s3 + $0x3a8] sm:$0xff] }
 0x282   : > { %3723 = vmatprep.subr.bf16.mxu0 %v3722_v36  ;;  %v1064_v36 = vld [vmem:[%s6159_s3 + $0x3b8] sm:$0xff] }
 0x283   : > { %v3758_v37 = vpack.c.bf16 %v1064_v36, %v1062_v22  ;;  %v3794_v36 = vpack.c.bf16 %v1100_v54, %v1098_v33 }
 0x285   : > { %3725 = vmatpush1.bf16.msra.mxu0 %v3724_v12  ;;  %v1066_v12 = vld [vmem:[%s6159_s3 + $0x3c8] sm:$0xff] }
 0x286   : > { %3727 = vmatprep.subr.bf16.mxu0 %v3726_v25  ;;  %v1068_v25 = vld [vmem:[%s6159_s3 + $0x3d8] sm:$0xff] }
 0x287   : > { %v3762_v28 = vpack.c.bf16 %v1068_v25, %v1066_v12  ;;  %v3798_v25 = vpack.c.bf16 %v1104_v27, %v1102_v47 }
 0x289   : > { %3729 = vmatpush1.bf16.msra.mxu0 %v3728_v15  ;;  %v1070_v15 = vld [vmem:[%s6159_s3 + $0x3e8] sm:$0xff] }
 0x28a   : > { %3731 = vmatprep.subr.bf16.mxu0 %v3730_v8  ;;  %v1072_v8 = vld [vmem:[%s6159_s3 + $0x3f8] sm:$0xff] }
 0x28b   : > { %v3766_v57 = vpack.c.bf16 %v1072_v8, %v1070_v15  ;;  %v3802_v8 = vpack.c.bf16 %v1108_v40, %v1106_v29 }
 0x28c   : > { %v5248_v7 = vpop.permute.xlu1 %4188 }
 0x28d   : > { %v4191_v5 = vunpack.i.h.bf16 %v5248_v7  ;;  %v4190_v44 = vunpack.i.l.bf16 %v5248_v7  ;;  %3733 = vmatpush1.bf16.msra.mxu0 %v3732_v58  ;;  %v1074_v58 = vld [vmem:[%s6159_s3 + $0x408] sm:$0xff] }
 0x28e   : > { %3735 = vmatprep.subr.bf16.mxu0 %v3734_v41  ;;  %v1076_v41 = vld [vmem:[%s6159_s3 + $0x418] sm:$0xff] }
 0x28f   : > { %v928_v52 = vsel %vm537_vm2, %v4190_v44, %v4191_v5  ;;  %v3770_v32 = vpack.c.bf16 %v1076_v41, %v1074_v58  ;;  %v3806_v41 = vpack.c.bf16 %v1112_v61, %v1110_v43 }
 0x290   : > { %v941_v17 = vmax.f32 %v5093_v10, %v928_v52  ;;  %v1052_v10 = vld [vmem:[%s6159_s3 + $0x358] sm:$0xff] }
 0x291   : > { %3737 = vmatpush1.bf16.msra.mxu0 %v3736_v51  ;;  %v3746_v38 = vpack.c.bf16 %v1052_v10, %v1050_v63  ;;  %v927_v51 = vsel %vm537_vm2, %v4181_v30, %v4190_v44  ;;  %v1079_v30 = vld [vmem:[%s6159_s3 + $0x430] sm:$0xff]  ;;  %v1082_v44 = vld [vmem:[%s6159_s3 + $0x448] sm:$0xff]  ;;  %v3782_v10 = vpack.c.bf16 %v1088_v19, %v1086_v18  ;;  %v1121_v18 = vld [vmem:[%s6159_s3 + $0x580] sm:$0xff] }
 0x292   : > { %1293 = vmatprep.mubr.f32.mxu0 %v941_v17  ;;  %3739 = vmatprep.subr.bf16.mxu0 %v3738_v53  ;;  %v1078_v53 = vld [vmem:[%s6159_s3 + $0x428] sm:$0xff]  ;;  %v940_v52 = vmax.f32 %v5074_v31, %v927_v51  ;;  %v3776_v31 = vpack.c.bf16 %v1079_v30, %v1077_v42  ;;  %v3778_v17 = vpack.c.bf16 %v1084_v16, %v1082_v44  ;;  %v1117_v44 = vld [vmem:[%s6159_s3 + $0x560] sm:$0xff]  ;;  %v1119_v16 = vld [vmem:[%s6159_s3 + $0x570] sm:$0xff] }
 0x293   : > { %v3774_v55 = vpack.c.bf16 %v1080_v13, %v1078_v53  ;;  %v3810_v53 = vpack.c.bf16 %v1116_v35, %v1114_v34  ;;  %v1113_v13 = vld [vmem:[%s6159_s3 + $0x540] sm:$0xff]  ;;  %v1123_v19 = vld [vmem:[%s6159_s3 + $0x590] sm:$0xff] }
 0x295   : > { %3741 = vmatpush1.bf16.msra.mxu0 %v3740_v39  ;;  %v1081_v39 = vld [vmem:[%s6159_s3 + $0x440] sm:$0xff] }
 0x296   : > { %3743 = vmatprep.subr.bf16.mxu0 %v3742_v3  ;;  %v1083_v3 = vld [vmem:[%s6159_s3 + $0x450] sm:$0xff] }
 0x297   : > { %v3780_v63 = vpack.c.bf16 %v1083_v3, %v1081_v39  ;;  %v3816_v39 = vpack.c.bf16 %v1119_v16, %v1117_v44 }
 0x299   : > { %3745 = vmatpush1.bf16.msra.mxu0 %v3744_v1  ;;  %v1085_v1 = vld [vmem:[%s6159_s3 + $0x460] sm:$0xff] }
 0x29a   : > { %3747 = vmatprep.subr.bf16.mxu0 %v3746_v38  ;;  %v1087_v38 = vld [vmem:[%s6159_s3 + $0x470] sm:$0xff] }
 0x29b   : > { %v3784_v24 = vpack.c.bf16 %v1087_v38, %v1085_v1  ;;  %v3820_v1 = vpack.c.bf16 %v1123_v19, %v1121_v18 }
 0x29d   : > { %3749 = vmatpush1.bf16.msra.mxu0 %v3748_v50  ;;  %v1089_v50 = vld [vmem:[%s6159_s3 + $0x480] sm:$0xff] }
 0x29e   : > { %3751 = vmatprep.subr.bf16.mxu0 %v3750_v0  ;;  %v1091_v0 = vld [vmem:[%s6159_s3 + $0x490] sm:$0xff] }
 0x29f   : > { %v3788_v46 = vpack.c.bf16 %v1091_v0, %v1089_v50  ;;  %v3824_v50 = vpack.c.bf16 %v1127_v21, %v1125_v20 }
 0x2a1   : > { %3753 = vmatpush1.bf16.msra.mxu0 %v3752_v26  ;;  %v1093_v26 = vld [vmem:[%s6159_s3 + $0x4a0] sm:$0xff] }
 0x2a2   : > { %3755 = vmatprep.subr.bf16.mxu0 %v3754_v2  ;;  %v1095_v2 = vld [vmem:[%s6159_s3 + $0x4b0] sm:$0xff] }
 0x2a3   : > { %v3792_v22 = vpack.c.bf16 %v1095_v2, %v1093_v26  ;;  %v3828_v2 = vpack.c.bf16 %v1131_v9, %v1129_v4  ;;  %v1506_v9 = vld [vmem:[%s6160_s4 + $0x8] sm:$0xff] }
 0x2a5   : > { %3757 = vmatpush1.bf16.msra.mxu0 %v3756_v45  ;;  %v1097_v45 = vld [vmem:[%s6159_s3 + $0x4c0] sm:$0xff] }
 0x2a6   : > { %3759 = vmatprep.subr.bf16.mxu0 %v3758_v37  ;;  %v1099_v37 = vld [vmem:[%s6159_s3 + $0x4d0] sm:$0xff] }
 0x2a7   : > { %v3796_v12 = vpack.c.bf16 %v1099_v37, %v1097_v45  ;;  %v1135_v45 = vld [vmem:[%s6159_s3 + $0x5f0] sm:$0xff] }
 0x2a9   : > { %3761 = vmatpush1.bf16.msra.mxu0 %v3760_v62  ;;  %v1101_v62 = vld [vmem:[%s6159_s3 + $0x4e0] sm:$0xff] }
 0x2aa   : > { %3763 = vmatprep.subr.bf16.mxu0 %v3762_v28  ;;  %v1103_v28 = vld [vmem:[%s6159_s3 + $0x4f0] sm:$0xff] }
 0x2ab   : > { %v3800_v15 = vpack.c.bf16 %v1103_v28, %v1101_v62 }
 0x2ad   : > { %3765 = vmatpush1.bf16.msra.mxu0 %v3764_v56  ;;  %v1105_v56 = vld [vmem:[%s6159_s3 + $0x500] sm:$0xff] }
 0x2ae   : > { %3767 = vmatprep.subr.bf16.mxu0 %v3766_v57  ;;  %v1107_v57 = vld [vmem:[%s6159_s3 + $0x510] sm:$0xff] }
 0x2af   : > { %v3804_v58 = vpack.c.bf16 %v1107_v57, %v1105_v56 }
 0x2b1   : > { %3769 = vmatpush1.bf16.msra.mxu0 %v3768_v11  ;;  %v1109_v11 = vld [vmem:[%s6159_s3 + $0x520] sm:$0xff] }
 0x2b2   : > { %3771 = vmatprep.subr.bf16.mxu0 %v3770_v32  ;;  %v1111_v32 = vld [vmem:[%s6159_s3 + $0x530] sm:$0xff] }
 0x2b3   : > { %v3808_v51 = vpack.c.bf16 %v1111_v32, %v1109_v11 }
 0x2b4   : > { %1294 = vmatmul.mubr.f32.vlgmr.msra.gmra.mrb[0].mxu0 %v940_v52  ;;  %v1118_v52 = vld [vmem:[%s6159_s3 + $0x568] sm:$0xff] }
 0x2b5   : > { %3773 = vmatpush1.bf16.msra.mxu0 %v3772_v14  ;;  %v1115_v14 = vld [vmem:[%s6159_s3 + $0x550] sm:$0xff] }
 0x2b6   : > { %3775 = vmatprep.subr.bf16.mxu0 %v3774_v55  ;;  %v1120_v55 = vld [vmem:[%s6159_s3 + $0x578] sm:$0xff]  ;;  %v3812_v42 = vpack.c.bf16 %v1115_v14, %v1113_v13 }
 0x2b7   : > { %v3814_v30 = vpack.c.bf16 %v1120_v55, %v1118_v52 }
 0x2b9   : > { %3777 = vmatpush1.bf16.msra.mxu0 %v3776_v31  ;;  %v1122_v31 = vld [vmem:[%s6159_s3 + $0x588] sm:$0xff] }
 0x2ba   : > { %3779 = vmatprep.subr.bf16.mxu0 %v3778_v17  ;;  %v1124_v17 = vld [vmem:[%s6159_s3 + $0x598] sm:$0xff] }
 0x2bb   : > { %v3818_v3 = vpack.c.bf16 %v1124_v17, %v1122_v31 }
 0x2bd   : > { %3781 = vmatpush1.bf16.msra.mxu0 %v3780_v63  ;;  %v1126_v63 = vld [vmem:[%s6159_s3 + $0x5a8] sm:$0xff] }
 0x2be   : > { %3783 = vmatprep.subr.bf16.mxu0 %v3782_v10  ;;  %v1128_v10 = vld [vmem:[%s6159_s3 + $0x5b8] sm:$0xff] }
 0x2bf   : > { %v3822_v38 = vpack.c.bf16 %v1128_v10, %v1126_v63 }
 0x2c1   : > { %3785 = vmatpush1.bf16.msra.mxu0 %v3784_v24  ;;  %v1130_v24 = vld [vmem:[%s6159_s3 + $0x5c8] sm:$0xff] }
 0x2c2   : > { %3787 = vmatprep.subr.bf16.mxu0 %v3786_v23  ;;  %v1132_v23 = vld [vmem:[%s6159_s3 + $0x5d8] sm:$0xff] }
 0x2c3   : > { %v3826_v0 = vpack.c.bf16 %v1132_v23, %v1130_v24 }
 0x2c5   : > { %3789 = vmatpush1.bf16.msra.mxu0 %v3788_v46  ;;  %v1134_v46 = vld [vmem:[%s6159_s3 + $0x5e8] sm:$0xff] }
 0x2c6   : > { %3791 = vmatprep.subr.bf16.mxu0 %v3790_v59  ;;  %v1136_v59 = vld [vmem:[%s6159_s3 + $0x5f8] sm:$0xff] }
 0x2c9   : > { %3793 = vmatpush1.bf16.msra.mxu0 %v3792_v22  ;;  %v3830_v22 = vpack.c.bf16 %v1136_v59, %v1134_v46 }
 0x2ca   : > { %3795 = vmatprep.subr.bf16.mxu0 %v3794_v36  ;;  %v1133_v36 = vld [vmem:[%s6159_s3 + $0x5e0] sm:$0xff] }
 0x2cb   : > { %v3832_v27 = vpack.c.bf16 %v1135_v45, %v1133_v36 }
 0x2cd   : > { %3797 = vmatpush1.bf16.msra.mxu0 %v3796_v12 }
 0x2ce   : > { %3799 = vmatprep.subr.bf16.mxu0 %v3798_v25 }
 0x2d1   : > { %3801 = vmatpush1.bf16.msra.mxu0 %v3800_v15 }
 0x2d2   : > { %3803 = vmatprep.subr.bf16.mxu0 %v3802_v8 }
 0x2d5   : > { %3805 = vmatpush1.bf16.msra.mxu0 %v3804_v58 }
 0x2d6   : > { %3807 = vmatprep.subr.bf16.mxu0 %v3806_v41 }
 0x2d9   : > { %3809 = vmatpush1.bf16.msra.mxu0 %v3808_v51 }
 0x2da   : > { %3811 = vmatprep.subr.bf16.mxu0 %v3810_v53 }
 0x2dd   : > { %3813 = vmatpush1.bf16.msra.mxu0 %v3812_v42 }
 0x2de   : > { %3815 = vmatprep.subr.bf16.mxu0 %v3814_v30 }
 0x2e1   : > { %3817 = vmatpush1.bf16.msra.mxu0 %v3816_v39 }
 0x2e2   : > { %3819 = vmatprep.subr.bf16.mxu0 %v3818_v3 }
 0x2e5   : > { %3821 = vmatpush1.bf16.msra.mxu0 %v3820_v1 }
 0x2e6   : > { %3823 = vmatprep.subr.bf16.mxu0 %v3822_v38 }
 0x2e9   : > { %3825 = vmatpush1.bf16.msra.mxu0 %v3824_v50  ;;  %v924_v26 = vpop.permute.xlu0 %923 }
 0x2ea   : > { %v944_v33 = vmax.f32 %v5166_v6, %v924_v26  ;;  %v922_v54 = vpop.permute.xlu1 %921  ;;  %3827 = vmatprep.subr.bf16.mxu0 %v3826_v0  ;;  %v1505_v0 = vld [vmem:[%s6160_s4] sm:$0xff] }
 0x2eb   : > { %v930_v37 = vsel %vm537_vm2, %v922_v54, %v924_v26  ;;  %v929_v6 = vsel %vm537_vm2, %v4191_v5, %v922_v54  ;;  %vm4350_vm2 = vmmov 1  }
 0x2ec   : > { %v943_v47 = vmax.f32 %v5170_v49, %v930_v37  ;;  %3201 = vmatmul.mubr.msk.f32.vlgmr.msra.gmra.mrb[0].mxu1 %vm1147_vm9, %v944_v33  ;;  %v942_v12 = vmax.f32 %v5097_v60, %v929_v6  ;;  %v1507_v60 = vld [vmem:[%s6161_s5] sm:$0xff]  ;;  %v1508_v37 = vld [vmem:[%s6161_s5 + $0x8] sm:$0xff]  ;;  %v1653_v6 = vld [vmem:[#allocation2 + $0x10] sm:$0xff] }
 0x2ed   : > { %3829 = vmatpush1.bf16.msra.mxu0 %v3828_v2  ;;  %1590 = vmatprep.mubr.f32.mxu1 %v4343_v48 }
 0x2ee   : > { %1364 = vmatprep.mubr.f32.mxu0 %v943_v47  ;;  %3831 = vmatprep.subr.bf16.mxu0 %v3830_v22  ;;  %v1651_v47 = vld [vmem:[#allocation2] sm:$0xff] }
 0x2f1   : > { %3833 = vmatpush1.bf16.msra.mxu0 %v3832_v27  ;;  %v1652_v27 = vld [vmem:[#allocation2 + $0x8] sm:$0xff] }
 0x2f4   : > { %1365 = vmatmul.mubr.f32.vlgmr.msra.gmra.mrb[0].mxu0 %v942_v12  ;;  %v4349_v12 = vmov 0.0|0.0  }
 0x2f5   : > { %3858 = vmatprep.subr.bf16.mxu0 %v4349_v12 }
 0x3bf   : > { %v1437_v25 = vpop.f32.mrb[0].mxu1 }
 0x3c0   : > { %v1439_v62 = vpop.f32.mrb[1].mxu1 }
 0x3c7   : > { %v1366_v28 = vpop.f32.mrb[0].mxu0 }
 0x3c8   : > { %v4042_v29 = vadd.f32 %v1437_v25, %v1366_v28  ;;  %v1368_v49 = vpop.f32.mrb[1].mxu0  ;;  %v3859_v25 = vpack.c.bf16 %v1652_v27, %v1651_v47 }
 0x3c9   : > { %v4043_v40 = vadd.f32 %v1439_v62, %v1368_v49  ;;  %v1654_v62 = vld [vmem:[#allocation2 + $0x18] sm:$0xff]  ;;  %v1656_v49 = vld [vmem:[#allocation2 + $0x28] sm:$0xff] }
 0x3ca   : > { %3860 = vmatpush1.bf16.msra.mxu0 %v3859_v25  ;;  %v3862_v28 = vpack.c.bf16 %v1654_v62, %v1653_v6 }
 0x3cb   : > { %v4197_v15 = vpack.i.bf16 %v4043_v40, %v4042_v29  ;;  %3861 = vmatprep.subr.bf16.mxu0 %v4349_v12 }
 0x3cd   : > { %4198 = vrot.lane.b32.xlu0 %v4197_v15, %s6181_s14  ;;  %4193 = vrot.lane.b32.xlu1 %v4197_v15, %s4335_s25 }
 0x3ce   : > { %3863 = vmatpush1.bf16.msra.mxu0 %v3862_v28 }
 0x3cf   : > { %3864 = vmatprep.subr.bf16.mxu0 %v4349_v12 }
 0x3d1   : > { %4208 = vrot.lane.b32.xlu0 %v4197_v15, %s4344_s22  ;;  %4203 = vrot.lane.b32.xlu1 %v4197_v15, %s4345_s24  ;;  %s336_s22 = sand.u32 1, %s4313_s10  }
 0x3d5   : > { %4218 = vrot.lane.b32.xlu0 %v4197_v15, %s6182_s26  ;;  %4213 = vrot.lane.b32.xlu1 %v4197_v15, %s4346_s23 }
 0x3d9   : > { %1497 = vrot.lane.b32.xlu0 %v4042_v29, %s4347_s28  ;;  %4223 = vrot.lane.b32.xlu1 %v4197_v15, %s4348_s27  ;;  %v1657_v15 = vld [vmem:[#allocation2 + $0x30] sm:$0xff]  ;;  %s337_s27 = scalar_lea.vmem [#allocation5], %s336_s22 }
 0x3da   : > { %s3125_s21 = sshll.u32 %s337_s27, 4  ;;  %s6116_s21 = int_to_ptr.vmem [resolvable:$true] %s3125_s21 }
 0x3db   : > { %s4255_s17 = scalar_lea.vmem %s6116_s21, 16 }
 0x3dc   : > { %p4256_p6 = scmp.ne.s32.totalorder %s6116_s21, %s4255_s17 }
 0x3dd   : > { %1511 = vperm.xlu0 %4165, %v1507_v60   ;;  %1499 = vrot.lane.b32.xlu1 %v4043_v40, %s4347_s28  ;;  %v1658_v60 = vld [vmem:[#allocation2 + $0x38] sm:$0xff]  ;;  %s3239_s28 = sshll.u32 %s4424_s13, 4  ;;  %s4352_s13 = smov [#allocation5]  }
 0x3de   : > { %s6114_s16 = scalar_lea.hbm %s6165_s9, %s3239_s28  ;;  %p4257_p10 = pnand %p4256_p6, %p6183_p9 }
 0x3df   : > { %s4259_s14 = sshll.u32 %s4352_s13, 4  ;;  %s4260_s14 = int_to_ptr.vmem [resolvable:$false] %s4259_s14 }
 0x3e0   : > { %p4258_p12 = pneg %p4257_p10  ;;  %s4261_s26 = scalar_lea.vmem %s4260_s14, 32 }
 0x3e1   : > { %p4262_p2 = scmp.lt.s32.totalorder %s6116_s21, %s4260_s14  ;;  %p4263_p3 = scmp.lt.s32.totalorder %s4261_s26, %s4255_s17 }
 0x3e3   : > { %p4264_p4 = por %p4263_p3, %p4262_p2 }
 0x3e5   : > { %p4265_p7 = pnand %p4264_p4, %p4258_p12 }
 0x43f   : > { %v4199_v7 = vpop.permute.xlu0 %4198  ;;  %v4194_v5 = vpop.permute.xlu1 %4193 }
 0x440   : > { %v4196_v8 = vunpack.i.h.bf16 %v4194_v5  ;;  %v4195_v56 = vunpack.i.l.bf16 %v4194_v5  ;;  %v4201_v57 = vunpack.i.h.bf16 %v4199_v7  ;;  %v4200_v43 = vunpack.i.l.bf16 %v4199_v7  ;;  %v1659_v5 = vld [vmem:[#allocation2 + $0x40] sm:$0xff] }
 0x441   : > { %v3868_v7 = vpack.c.bf16 %v1658_v60, %v1657_v15 }
 0x442   : > { %v3842_v61 = vpack.c.bf16 %v4196_v8, %v4043_v40  ;;  %v1448_v58 = vsel %vm431_vm0, %v4195_v56, %v4196_v8  ;;  %v1455_v13 = vsel %vm484_vm1, %v4200_v43, %v4201_v57  ;;  %v1660_v8 = vld [vmem:[#allocation2 + $0x48] sm:$0xff]  ;;  %v1662_v43 = vld [vmem:[#allocation2 + $0x58] sm:$0xff]  ;;  %vm1684_vm1 = vcmask 1044480  }
 0x443   : > { %v3844_v41 = vpack.c.bf16 %v1448_v58, %v4042_v29  ;;  %v4209_v11 = vpop.permute.xlu0 %4208  ;;  %v4204_v32 = vpop.permute.xlu1 %4203  ;;  %v1655_v29 = vld [vmem:[#allocation2 + $0x20] sm:$0xff]  ;;  %v3871_v56 = vpack.c.bf16 %v1660_v8, %v1659_v5  ;;  %vm3896_vm3 = vmpackc.low %vm1684_vm1, %vm4350_vm2  ;;  %v1770_v5 = vld [vmem:[%s6163_s7 + $0x38] sm:$0xff] }
 0x444   : > { %v4206_v34 = vunpack.i.h.bf16 %v4204_v32  ;;  %v4205_v35 = vunpack.i.l.bf16 %v4204_v32  ;;  %3843 = vmatprep.subr.bf16.mxu1 %v3842_v61  ;;  %v4211_v51 = vunpack.i.h.bf16 %v4209_v11  ;;  %v4210_v53 = vunpack.i.l.bf16 %v4209_v11  ;;  %v1663_v58 = vld [vmem:[#allocation2 + $0x60] sm:$0xff]  ;;  %v1665_v32 = vld [vmem:[#allocation2 + $0x70] sm:$0xff] }
 0x445   : > { %3845 = vmatpush1.bf16.msra.mxu1 %v3844_v41  ;;  %v3865_v40 = vpack.c.bf16 %v1656_v49, %v1655_v29  ;;  %v1664_v41 = vld [vmem:[#allocation2 + $0x68] sm:$0xff]  ;;  %v1769_v29 = vld [vmem:[%s6163_s7 + $0x30] sm:$0x1]  ;;  %v1771_v8 = vld [vmem:[%s6163_s7 + $0x40] sm:$0xff] }
 0x446   : > { %v3846_v14 = vpack.c.bf16 %v4206_v34, %v4201_v57  ;;  %v1463_v52 = vsel %vm1462_vm10, %v4205_v35, %v4206_v34  ;;  %v1471_v31 = vsel %vm1470_vm11, %v4210_v53, %v4211_v51  ;;  %v1661_v57 = vld [vmem:[#allocation2 + $0x50] sm:$0xff]  ;;  %v3877_v11 = vpack.c.bf16 %v1664_v41, %v1663_v58  ;;  %v1666_v34 = vld [vmem:[#allocation2 + $0x78] sm:$0xff]  ;;  %v1668_v53 = vld [vmem:[#allocation2 + $0x88] sm:$0xff] }
 0x447   : > { %v3848_v55 = vpack.c.bf16 %v1463_v52, %v1455_v13  ;;  %v4219_v42 = vpop.permute.xlu0 %4218  ;;  %v4214_v30 = vpop.permute.xlu1 %4213  ;;  %3866 = vmatpush1.bf16.msra.mxu0 %v3865_v40  ;;  %v3874_v61 = vpack.c.bf16 %v1662_v43, %v1661_v57  ;;  %v3880_v35 = vpack.c.bf16 %v1666_v34, %v1665_v32  ;;  %v1670_v52 = vld [vmem:[#allocation2 + $0x98] sm:$0xff]  ;;  %v1772_v57 = vld [vmem:[%s6163_s7 + $0x48] sm:$0xff]  ;;  %v1773_v43 = vld [vmem:[%s6163_s7 + $0x50] sm:$0xff] }
 0x448   : > { %v4216_v44 = vunpack.i.h.bf16 %v4214_v30  ;;  %v4215_v16 = vunpack.i.l.bf16 %v4214_v30  ;;  %3847 = vmatprep.subr.bf16.mxu1 %v3846_v14  ;;  %v4221_v17 = vunpack.i.h.bf16 %v4219_v42  ;;  %v4220_v39 = vunpack.i.l.bf16 %v4219_v42  ;;  %3867 = vmatprep.subr.bf16.mxu0 %v4349_v12  ;;  %v1669_v14 = vld [vmem:[#allocation2 + $0x90] sm:$0xff]  ;;  %v1671_v42 = vld [vmem:[#allocation2 + $0xa0] sm:$0xff]  ;;  %v1672_v30 = vld [vmem:[#allocation2 + $0xa8] sm:$0xff] }
 0x449   : > { %3849 = vmatpush1.bf16.msra.mxu1 %v3848_v55  ;;  %v3886_v55 = vpack.c.bf16 %v1670_v52, %v1669_v14  ;;  %v3911_v41 = vpack.c.bf16 %v1773_v43, %v1772_v57  ;;  %v1775_v32 = vld [vmem:[%s6163_s7 + $0x60] sm:$0xff]  ;;  %v1812_v43 = vld [vmem:[%s6163_s7 + $0x188] sm:$0xff] }
 0x44a   : > { %v3850_v3 = vpack.c.bf16 %v4216_v44, %v4211_v51  ;;  %v1479_v18 = vsel %vm1478_vm12, %v4215_v16, %v4216_v44  ;;  %v1486_v38 = vsel %vm643_vm4, %v4220_v39, %v4221_v17  ;;  %v1667_v51 = vld [vmem:[#allocation2 + $0x80] sm:$0xff]  ;;  %v3889_v44 = vpack.c.bf16 %v1672_v30, %v1671_v42  ;;  %v1673_v16 = vld [vmem:[#allocation2 + $0xb0] sm:$0xff] }
 0x44b   : > { %v3852_v19 = vpack.c.bf16 %v1479_v18, %v1471_v31  ;;  %v4224_v63 = vpop.permute.xlu1 %4223  ;;  %v1498_v50 = vpop.permute.xlu0 %1497  ;;  %3869 = vmatpush1.bf16.msra.mxu0 %v3868_v7  ;;  %v3883_v13 = vpack.c.bf16 %v1668_v53, %v1667_v51  ;;  %v1674_v31 = vld [vmem:[#allocation2 + $0xb8] sm:$0xff]  ;;  %v1675_v39 = vld [vmem:[#allocation2 + $0xc0] sm:$0xff]  ;;  %vm1677_vm4 = vcmask 629760   ;;  %v1776_v53 = vld [vmem:[%s6163_s7 + $0x68] sm:$0x1] }
 0x44c   : > { %v4226_v10 = vunpack.i.h.bf16 %v4224_v63  ;;  %v4225_v1 = vunpack.i.l.bf16 %v4224_v63  ;;  %3851 = vmatprep.subr.bf16.mxu1 %v3850_v3  ;;  %3870 = vmatprep.subr.bf16.mxu0 %v4349_v12  ;;  %v1676_v3 = vld [vmem:[#allocation2 + $0xc8] sm:$0x1f]  ;;  %v1778_v51 = vld [vmem:[%s6163_s7 + $0x78] sm:$0xff]  ;;  %v1779_v52 = vld [vmem:[%s6163_s7 + $0x80] sm:$0xff] }
 0x44d   : > { %3853 = vmatpush1.bf16.msra.mxu1 %v3852_v19  ;;  %v3895_v18 = vpack.c.bf16 %v1676_v3, %v1675_v39  ;;  %v1781_v30 = vld [vmem:[%s6163_s7 + $0x90] sm:$0xff]  ;;  %v1783_v39 = vld [vmem:[%s6163_s7 + $0xa0] sm:$0x1] }
 0x44e   : > { %v3854_v20 = vpack.c.bf16 %v4226_v10, %v4221_v17  ;;  %v1494_v21 = vsel %vm1493_vm13, %v4225_v1, %v4226_v10  ;;  %v3892_v17 = vpack.c.bf16 %v1674_v31, %v1673_v16  ;;  %v1784_v31 = vld [vmem:[%s6163_s7 + $0xa8] sm:$0xff] }
 0x44f   : > { %v3856_v24 = vpack.c.bf16 %v1494_v21, %v1486_v38  ;;  %v1500_v23 = vpop.permute.xlu1 %1499  ;;  %3872 = vmatpush1.bf16.msra.mxu0 %v3871_v56  ;;  %v3908_v56 = vpack.c.bf16 %v1771_v8, %v1770_v5  ;;  %v1809_v8 = vld [vmem:[%s6163_s7 + $0x170] sm:$0xff] }
 0x450   : > { %3855 = vmatprep.subr.bf16.mxu1 %v3854_v20  ;;  %v1502_v4 = vsel %vm1501_vm14, %v1498_v50, %v1500_v23  ;;  %3873 = vmatprep.subr.bf16.mxu0 %v4349_v12 }
 0x451   : > { %3857 = vmatpush1.bf16.msra.mxu1 %v3856_v24 }
 0x452   : > { %1542 = vmatprep.subr.mxu1 %v1500_v23 }
 0x453   : > { %3875 = vmatpush1.bf16.msra.mxu0 %v3874_v61 }
 0x454   : > { %3876 = vmatprep.subr.bf16.mxu0 %v4349_v12 }
 0x455   : > { %1543 = vmatpush1.msra.mxu1 %v1502_v4 }
 0x456   : > { %3202 = vmatmul.mubr.msk.f32.vlgmr.msra.gmra.mrb[2].mxu1 %vm1519_vm15, %v1505_v0  ;;  %3898 = vmatprep.subr.bf16.mxu1 %v4349_v12 }
 0x457   : > { %1596 = vmatprep.mubr.f32.mxu1 %v4343_v48  ;;  %3878 = vmatpush1.bf16.msra.mxu0 %v3877_v11  ;;  %v1774_v11 = vld [vmem:[%s6163_s7 + $0x58] sm:$0xff] }
 0x458   : > { %3879 = vmatprep.subr.bf16.mxu0 %v4349_v12  ;;  %v3914_v34 = vpack.c.bf16 %v1775_v32, %v1774_v11 }
 0x45a   : > { %3203 = vmatmul.mubr.msk.f32.gmra.mrb[4].mxu1 %vm1519_vm15, %v1506_v9 }
 0x45b   : > { %3881 = vmatpush1.bf16.msra.mxu0 %v3880_v35  ;;  %v1777_v35 = vld [vmem:[%s6163_s7 + $0x70] sm:$0xff] }
 0x45c   : > { %v1512_v46 = vpop.permute.xlu0 %1511  ;;  %3882 = vmatprep.subr.bf16.mxu0 %v4349_v12 }
 0x45f   : > { %3884 = vmatpush1.bf16.msra.mxu0 %v3883_v13  ;;  %v3917_v13 = vpack.c.bf16 %v1778_v51, %v1777_v35  ;;  %v1815_v35 = vld [vmem:[%s6163_s7 + $0x1a0] sm:$0xff] }
 0x460   : > { %3885 = vmatprep.subr.bf16.mxu0 %v4349_v12 }
 0x463   : > { %3887 = vmatpush1.bf16.msra.mxu0 %v3886_v55  ;;  %v1780_v55 = vld [vmem:[%s6163_s7 + $0x88] sm:$0xff] }
 0x464   : > { %3888 = vmatprep.subr.bf16.mxu0 %v4349_v12  ;;  %v3920_v42 = vpack.c.bf16 %v1780_v55, %v1779_v52  ;;  %v1819_v52 = vld [vmem:[%s6163_s7 + $0x1c0] sm:$0xff]  ;;  %v1820_v55 = vld [vmem:[%s6163_s7 + $0x1c8] sm:$0xff] }
 0x467   : > { %3890 = vmatpush1.bf16.msra.mxu0 %v3889_v44  ;;  %v1782_v44 = vld [vmem:[%s6163_s7 + $0x98] sm:$0xff] }
 0x468   : > { %3891 = vmatprep.subr.bf16.mxu0 %v4349_v12  ;;  %v3923_v16 = vpack.c.bf16 %v1782_v44, %v1781_v30  ;;  %v3971_v30 = vpack.c.bf16 %v1820_v55, %v1819_v52  ;;  %v1857_v52 = vld [vmem:[%s6163_s7 + $0x2f0] sm:$0xff] }
 0x46b   : > { %3893 = vmatpush1.bf16.msra.mxu0 %v3892_v17  ;;  %v1785_v17 = vld [vmem:[%s6163_s7 + $0xb0] sm:$0xff] }
 0x46c   : > { %3894 = vmatprep.subr.bf16.mxu0 %v4349_v12  ;;  %v3926_v3 = vpack.c.bf16 %v1785_v17, %v1784_v31  ;;  %v1822_v31 = vld [vmem:[%s6163_s7 + $0x1d8] sm:$0xff] }
 0x46f   : > { %3897 = vmatpush1.bf16.msk.msra.mxu0 %vm3896_vm3, %v3895_v18 }
 0x529   : > { %v1592_v59 = vpop.f32.mrb[2].mxu1 }
 0x52a   : > { %v5572_v26 = vadd.f32 %v1592_v59, %v1512_v46  ;;  %v1594_v2 = vpop.f32.mrb[3].mxu1 }
 0x52b   : > { %v5574_v33 = vadd.f32 %v1594_v2, %v1512_v46  ;;  %v1764_v2 = vld [vmem:[%s6163_s7 + $0x8] sm:$0xff] }
 0x52c   : > { %v1603_v54 = vmax.f32 %v5572_v26, 0.0  ;;  %v1763_v26 = vld [vmem:[%s6163_s7] sm:$0xff] }
 0x52d   : > { %v1604_v22 = vmax.f32 %v5574_v33, 0.0  ;;  %v5578_v36 = vpop.f32.mrb[4].mxu1  ;;  %v1765_v33 = vld [vmem:[%s6163_s7 + $0x10] sm:$0xff] }
 0x52e   : > { %1611 = vrot.lane.b32.xlu1 %v1603_v54, %s4335_s25  ;;  %v5583_v45 = vpop.f32.mrb[5].mxu1 }
 0x52f   : > { %1613 = vrot.lane.b32.xlu0 %v1604_v22, %s4335_s25 }
 0x532   : > { %1516 = vperm.xlu1 %4166, %v1508_v37   ;;  %v1768_v37 = vld [vmem:[%s6163_s7 + $0x28] sm:$0xff] }
 0x5a0   : > { %v1612_v19 = vpop.permute.xlu1 %1611 }
 0x5a1   : > { %v1614_v63 = vpop.permute.xlu0 %1613 }
 0x5a2   : > { %v1619_v10 = vsel %vm431_vm0, %v1612_v19, %v1614_v63  ;;  %v1626_v1 = vmax.f32 %v1604_v22, %v1614_v63  ;;  %v1766_v22 = vld [vmem:[%s6163_s7 + $0x18] sm:$0xff]  ;;  %v1787_v63 = vld [vmem:[%s6163_s7 + $0xc0] sm:$0xff] }
 0x5a3   : > { %v1625_v38 = vmax.f32 %v1603_v54, %v1619_v10  ;;  %v3899_v54 = vpack.c.bf16 %v1764_v2, %v1763_v26  ;;  %v1786_v19 = vld [vmem:[%s6163_s7 + $0xb8] sm:$0xff]  ;;  %v1796_v26 = vld [vmem:[%s6163_s7 + $0x108] sm:$0xff] }
 0x5a4   : > { %1635 = vrot.lane.b32.xlu1 %v1626_v1, %s4345_s24  ;;  %v3929_v10 = vpack.c.bf16 %v1787_v63, %v1786_v19  ;;  %v1826_v19 = vld [vmem:[%s6163_s7 + $0x1f8] sm:$0xff]  ;;  %v1827_v63 = vld [vmem:[%s6163_s7 + $0x200] sm:$0xff] }
 0x5a5   : > { %1633 = vrot.lane.b32.xlu0 %v1625_v38, %s4345_s24  ;;  %3900 = vmatpush3.bf16.msra.mxu1 %v3899_v54  ;;  %v1799_v54 = vld [vmem:[%s6163_s7 + $0x120] sm:$0xff] }
 0x5a6   : > { %3901 = vmatprep.subr.bf16.mxu1 %v4349_v12 }
 0x5b1   : > { %v1517_v20 = vpop.permute.xlu1 %1516 }
 0x5b2   : > { %v1599_v21 = vadd.f32 %v5578_v36, %v1517_v20  ;;  %v1601_v24 = vadd.f32 %v5583_v45, %v1517_v20  ;;  %v3902_v36 = vpack.c.bf16 %v1766_v22, %v1765_v33  ;;  %v1767_v45 = vld [vmem:[%s6163_s7 + $0x20] sm:$0xff]  ;;  %v1798_v33 = vld [vmem:[%s6163_s7 + $0x118] sm:$0xff]  ;;  %v1797_v22 = vld [vmem:[%s6163_s7 + $0x110] sm:$0x1] }
 0x5b3   : > { %v3905_v62 = vpack.c.bf16 %v1768_v37, %v1767_v45  ;;  %v1800_v37 = vld [vmem:[%s6163_s7 + $0x128] sm:$0xff] }
 0x5b4   : > { %v1605_v23 = vmax.f32 %v1599_v21, 0.0  ;;  %v1606_v50 = vmax.f32 %v1601_v24, 0.0  ;;  %3903 = vmatpush3.bf16.msra.mxu1 %v3902_v36  ;;  %v1791_v21 = vld [vmem:[%s6163_s7 + $0xe0] sm:$0xff]  ;;  %v1792_v24 = vld [vmem:[%s6163_s7 + $0xe8] sm:$0xff]  ;;  %v3944_v36 = vpack.c.bf16 %v1799_v54, %v1798_v33 }
 0x5b5   : > { %3904 = vmatprep.subr.bf16.mxu1 %v4349_v12  ;;  %v1836_v33 = vld [vmem:[%s6163_s7 + $0x248] sm:$0xff] }
 0x5b6   : > { %1617 = vrot.lane.b32.xlu1 %v1606_v50, %s4335_s25  ;;  %1615 = vrot.lane.b32.xlu0 %v1605_v23, %s4335_s25  ;;  %s3113_s25 = scalar_lea.sflag [#allocation4], %s336_s22 }
 0x5b8   : > { %3906 = vmatpush3.bf16.msra.mxu1 %v3905_v62 }
 0x5b9   : > { %3382 = vmatprep.subr.mxu1 %v4343_v48 }
 0x5bc   : > { %3383 = vmatpush3.msk.msra.mxu1 %vm1880_vm5, %v1769_v29  ;;  %v1806_v29 = vld [vmem:[%s6163_s7 + $0x158] sm:$0xff] }
 0x5bd   : > { %3907 = vmatprep.subr.bf16.mxu1 %v4349_v12 }
 0x616   : > { %v1636_v0 = vpop.permute.xlu1 %1635 }
 0x617   : > { %v1648_v4 = vmax.f32 %v1626_v1, %v1636_v0  ;;  %v1634_v9 = vpop.permute.xlu0 %1633  ;;  %v1788_v1 = vld [vmem:[%s6163_s7 + $0xc8] sm:$0xff] }
 0x618   : > { %v1641_v46 = vsel %vm1462_vm10, %v1634_v9, %v1636_v0  ;;  %v1794_v9 = vld [vmem:[%s6163_s7 + $0xf8] sm:$0xff] }
 0x619   : > { %v1647_v59 = vmax.f32 %v1625_v38, %v1641_v46  ;;  %3205 = vmatprep.mubr.msk.f32.mxu0 %vm1677_vm4, %v1648_v4  ;;  %v1789_v38 = vld [vmem:[%s6163_s7 + $0xd0] sm:$0xff] }
 0x61a   : > { %v3932_v20 = vpack.c.bf16 %v1789_v38, %v1788_v1  ;;  %v1793_v4 = vld [vmem:[%s6163_s7 + $0xf0] sm:$0xff]  ;;  %v1828_v1 = vld [vmem:[%s6163_s7 + $0x208] sm:$0xff] }
 0x61b   : > { %1753 = vmatmul.mubr.f32.vlgmr.msra.gmra.mrb[2].mxu0 %v1647_v59  ;;  %v3938_v46 = vpack.c.bf16 %v1794_v9, %v1793_v4  ;;  %v1795_v59 = vld [vmem:[%s6163_s7 + $0x100] sm:$0xff]  ;;  %v1829_v38 = vld [vmem:[%s6163_s7 + $0x210] sm:$0xff]  ;;  %v1834_v9 = vld [vmem:[%s6163_s7 + $0x238] sm:$0xff] }
 0x61c   : > { %v3941_v2 = vpack.c.bf16 %v1796_v26, %v1795_v59  ;;  %v1833_v4 = vld [vmem:[%s6163_s7 + $0x230] sm:$0xff] }
 0x61d   : > { %v3989_v59 = vpack.c.bf16 %v1834_v9, %v1833_v4  ;;  %v1871_v4 = vld [vmem:[%s6163_s7 + $0x360] sm:$0xff] }
 0x628   : > { %v1616_v47 = vpop.permute.xlu0 %1615  ;;  %v1618_v27 = vpop.permute.xlu1 %1617 }
 0x629   : > { %v1620_v6 = vsel %vm431_vm0, %v1616_v47, %v1618_v27  ;;  %v1628_v25 = vmax.f32 %v1606_v50, %v1618_v27  ;;  %vm4351_vm0 = vmmov 0   ;;  %v3935_v50 = vpack.c.bf16 %v1792_v24, %v1791_v21  ;;  %v1801_v47 = vld [vmem:[%s6163_s7 + $0x130] sm:$0xff] }
 0x62a   : > { %v1627_v28 = vmax.f32 %v1605_v23, %v1620_v6  ;;  %3384 = vmatprep.mubr.msk.f32.mxu1 %vm4351_vm0, %v4343_v48  ;;  %v1790_v23 = vld [vmem:[%s6163_s7 + $0xd8] sm:$0x1]  ;;  %v3947_v27 = vpack.c.bf16 %v1801_v47, %v1800_v37  ;;  %v3983_v24 = vpack.c.bf16 %v1829_v38, %v1828_v1  ;;  %v1840_v37 = vld [vmem:[%s6163_s7 + $0x268] sm:$0xff]  ;;  %v1841_v47 = vld [vmem:[%s6163_s7 + $0x270] sm:$0xff] }
 0x62b   : > { %1639 = vrot.lane.b32.xlu1 %v1628_v25, %s4345_s24  ;;  %v1802_v6 = vld [vmem:[%s6163_s7 + $0x138] sm:$0xff]  ;;  %v1868_v38 = vld [vmem:[%s6163_s7 + $0x348] sm:$0xff] }
 0x62c   : > { %1637 = vrot.lane.b32.xlu0 %v1627_v28, %s4345_s24 }
 0x69d   : > { %v1640_v49 = vpop.permute.xlu1 %1639 }
 0x69e   : > { %v1650_v40 = vmax.f32 %v1628_v25, %v1640_v49  ;;  %v1638_v15 = vpop.permute.xlu0 %1637  ;;  %v1803_v25 = vld [vmem:[%s6163_s7 + $0x140] sm:$0xff] }
 0x69f   : > { %v1642_v60 = vsel %vm1462_vm10, %v1638_v15, %v1640_v49  ;;  %v3950_v62 = vpack.c.bf16 %v1803_v25, %v1802_v6  ;;  %v1804_v49 = vld [vmem:[%s6163_s7 + $0x148] sm:$0x1]  ;;  %v3998_v6 = vpack.c.bf16 %v1841_v47, %v1840_v37 }
 0x6a0   : > { %v1649_v7 = vmax.f32 %v1627_v28, %v1642_v60  ;;  %3206 = vmatprep.mubr.msk.f32.mxu0 %vm1677_vm4, %v1650_v40  ;;  %v1805_v28 = vld [vmem:[%s6163_s7 + $0x150] sm:$0xff]  ;;  %v1807_v60 = vld [vmem:[%s6163_s7 + $0x160] sm:$0xff] }
 0x6a1   : > { %v3953_v40 = vpack.c.bf16 %v1806_v29, %v1805_v28  ;;  %v1843_v28 = vld [vmem:[%s6163_s7 + $0x280] sm:$0xff] }
 0x6a2   : > { %1758 = vmatmul.mubr.f32.gmra.mrb[4].mxu0 %v1649_v7  ;;  %v1808_v7 = vld [vmem:[%s6163_s7 + $0x168] sm:$0xff] }
 0x6a3   : > { %v3956_v5 = vpack.c.bf16 %v1808_v7, %v1807_v60  ;;  %v1847_v60 = vld [vmem:[%s6163_s7 + $0x2a0] sm:$0xff]  ;;  %v1848_v7 = vld [vmem:[%s6163_s7 + $0x2a8] sm:$0xff] }
 0x6ee   : > { %v5663_v61 = vpop.f32.mrb[2].mxu0 }
 0x6ef   : > { %v1756_v58 = vpop.f32.mrb[3].mxu0  ;;  %3385 = vmatmul.mubr.msk.f32.vlgmr.msra.gmra.mrb[6].mxu1 %vm1876_vm6, %v5663_v61  ;;  %v1955_v14 = vrot.slane %v5663_v61, 1  ;;  %v2032_v18 = vrot.slane %v5663_v61, 2  ;;  %v2109_v0 = vrot.slane %v5663_v61, 3  ;;  %v2186_v45 = vrot.slane %v5663_v61, 4 }
 0x6f0   : > { %3909 = vmatpush3.bf16.msra.mxu1 %v3908_v56  ;;  %3401 = vmatprep.mubr.msk.f32.mxu1 %vm4351_vm0, %v4343_v48  ;;  %v2263_v15 = vrot.slane %v5663_v61, 5  ;;  %v1810_v56 = vld [vmem:[%s6163_s7 + $0x178] sm:$0xff]  ;;  %v1813_v58 = vld [vmem:[%s6163_s7 + $0x190] sm:$0xff]  ;;  %v2340_v32 = vrot.slane %v5663_v61, 6  ;;  %v2417_v44 = vrot.slane %v5663_v61, 7  ;;  %v1823_v61 = vld [vmem:[%s6163_s7 + $0x1e0] sm:$0xff] }
 0x6f1   : > { %3910 = vmatprep.subr.bf16.mxu1 %v4349_v12  ;;  %v3959_v57 = vpack.c.bf16 %v1810_v56, %v1809_v8  ;;  %v3962_v11 = vpack.c.bf16 %v1813_v58, %v1812_v43  ;;  %v4007_v8 = vpack.c.bf16 %v1848_v7, %v1847_v60  ;;  %v1850_v43 = vld [vmem:[%s6163_s7 + $0x2b8] sm:$0xff] }
 0x6f4   : > { %3912 = vmatpush3.bf16.msra.mxu1 %v3911_v41  ;;  %v1811_v41 = vld [vmem:[%s6163_s7 + $0x180] sm:$0x1] }
 0x6f5   : > { %3913 = vmatprep.subr.bf16.mxu1 %v4349_v12 }
 0x6f8   : > { %3915 = vmatpush3.bf16.msra.mxu1 %v3914_v34  ;;  %v1814_v34 = vld [vmem:[%s6163_s7 + $0x198] sm:$0xff] }
 0x6f9   : > { %3399 = vmatprep.subr.mxu1 %v4343_v48  ;;  %v3965_v51 = vpack.c.bf16 %v1815_v35, %v1814_v34  ;;  %v1854_v34 = vld [vmem:[%s6163_s7 + $0x2d8] sm:$0xff]  ;;  %v1855_v35 = vld [vmem:[%s6163_s7 + $0x2e0] sm:$0xff] }
 0x6fc   : > { %3400 = vmatpush3.msk.msra.mxu1 %vm1880_vm5, %v1776_v53  ;;  %v1816_v53 = vld [vmem:[%s6163_s7 + $0x1a8] sm:$0xff] }
 0x6fd   : > { %3402 = vmatmul.mubr.msk.f32.vlgmr.msra.gmra.mrb[6].mxu1 %vm1876_vm6, %v1955_v14  ;;  %3916 = vmatprep.subr.bf16.mxu1 %v4349_v12 }
 0x6fe   : > { %3918 = vmatpush3.bf16.msra.mxu1 %v3917_v13  ;;  %3418 = vmatprep.mubr.msk.f32.mxu1 %vm4351_vm0, %v4343_v48  ;;  %v1817_v13 = vld [vmem:[%s6163_s7 + $0x1b0] sm:$0xff] }
 0x6ff   : > { %3919 = vmatprep.subr.bf16.mxu1 %v4349_v12  ;;  %v3968_v14 = vpack.c.bf16 %v1817_v13, %v1816_v53  ;;  %v4016_v53 = vpack.c.bf16 %v1855_v35, %v1854_v34 }
 0x702   : > { %3921 = vmatpush3.bf16.msra.mxu1 %v3920_v42  ;;  %v1818_v42 = vld [vmem:[%s6163_s7 + $0x1b8] sm:$0x1] }
 0x703   : > { %3922 = vmatprep.subr.bf16.mxu1 %v4349_v12 }
 0x706   : > { %3924 = vmatpush3.bf16.msra.mxu1 %v3923_v16  ;;  %v1821_v16 = vld [vmem:[%s6163_s7 + $0x1d0] sm:$0xff] }
 0x707   : > { %3416 = vmatprep.subr.mxu1 %v4343_v48  ;;  %v3974_v17 = vpack.c.bf16 %v1822_v31, %v1821_v16  ;;  %v1861_v16 = vld [vmem:[%s6163_s7 + $0x310] sm:$0xff]  ;;  %v1862_v31 = vld [vmem:[%s6163_s7 + $0x318] sm:$0xff] }
 0x70a   : > { %3417 = vmatpush3.msk.msra.mxu1 %vm1880_vm5, %v1783_v39  ;;  %v1824_v39 = vld [vmem:[%s6163_s7 + $0x1e8] sm:$0xff] }
 0x70b   : > { %3419 = vmatmul.mubr.msk.f32.vlgmr.msra.gmra.mrb[6].mxu1 %vm1876_vm6, %v2032_v18  ;;  %3925 = vmatprep.subr.bf16.mxu1 %v4349_v12  ;;  %v1825_v18 = vld [vmem:[%s6163_s7 + $0x1f0] sm:$0x1] }
 0x70c   : > { %3927 = vmatpush3.bf16.msra.mxu1 %v3926_v3  ;;  %3435 = vmatprep.mubr.msk.f32.mxu1 %vm4351_vm0, %v4343_v48  ;;  %v3977_v3 = vpack.c.bf16 %v1824_v39, %v1823_v61  ;;  %v4025_v61 = vpack.c.bf16 %v1862_v31, %v1861_v16 }
 0x70d   : > { %3928 = vmatprep.subr.bf16.mxu1 %v4349_v12 }
 0x710   : > { %3930 = vmatpush3.bf16.msra.mxu1 %v3929_v10  ;;  %v3980_v10 = vpack.c.bf16 %v1827_v63, %v1826_v19  ;;  %v1865_v63 = vld [vmem:[%s6163_s7 + $0x330] sm:$0xff] }
 0x711   : > { %3931 = vmatprep.subr.bf16.mxu1 %v4349_v12 }
 0x714   : > { %3933 = vmatpush3.bf16.msra.mxu1 %v3932_v20 }
 0x715   : > { %3433 = vmatprep.subr.mxu1 %v4343_v48 }
 0x718   : > { %3434 = vmatpush3.msk.msra.mxu1 %vm1880_vm5, %v1790_v23  ;;  %v1830_v23 = vld [vmem:[%s6163_s7 + $0x218] sm:$0xff] }
 0x719   : > { %3436 = vmatmul.mubr.msk.f32.vlgmr.msra.gmra.mrb[6].mxu1 %vm1876_vm6, %v2109_v0  ;;  %3934 = vmatprep.subr.bf16.mxu1 %v4349_v12 }
 0x71a   : > { %3936 = vmatpush3.bf16.msra.mxu1 %v3935_v50  ;;  %3452 = vmatprep.mubr.msk.f32.mxu1 %vm4351_vm0, %v4343_v48  ;;  %v1831_v50 = vld [vmem:[%s6163_s7 + $0x220] sm:$0xff] }
 0x71b   : > { %3937 = vmatprep.subr.bf16.mxu1 %v4349_v12  ;;  %v3986_v0 = vpack.c.bf16 %v1831_v50, %v1830_v23 }
 0x71e   : > { %3939 = vmatpush3.bf16.msra.mxu1 %v3938_v46  ;;  %v1832_v46 = vld [vmem:[%s6163_s7 + $0x228] sm:$0x1] }
 0x71f   : > { %3940 = vmatprep.subr.bf16.mxu1 %v4349_v12 }
 0x722   : > { %3942 = vmatpush3.bf16.msra.mxu1 %v3941_v2  ;;  %v1835_v2 = vld [vmem:[%s6163_s7 + $0x240] sm:$0xff] }
 0x723   : > { %3450 = vmatprep.subr.mxu1 %v4343_v48  ;;  %v3992_v54 = vpack.c.bf16 %v1836_v33, %v1835_v2  ;;  %v1874_v2 = vld [vmem:[%s6163_s7 + $0x378] sm:$0x1] }
 0x726   : > { %3451 = vmatpush3.msk.msra.mxu1 %vm1880_vm5, %v1797_v22  ;;  %v1837_v22 = vld [vmem:[%s6163_s7 + $0x250] sm:$0xff] }
 0x727   : > { %3453 = vmatmul.mubr.msk.f32.vlgmr.msra.gmra.mrb[6].mxu1 %vm1876_vm6, %v2186_v45  ;;  %3943 = vmatprep.subr.bf16.mxu1 %v4349_v12 }
 0x728   : > { %3945 = vmatpush3.bf16.msra.mxu1 %v3944_v36  ;;  %3469 = vmatprep.mubr.msk.f32.mxu1 %vm4351_vm0, %v4343_v48  ;;  %v1838_v36 = vld [vmem:[%s6163_s7 + $0x258] sm:$0xff] }
 0x729   : > { %3946 = vmatprep.subr.bf16.mxu1 %v4349_v12  ;;  %v3995_v45 = vpack.c.bf16 %v1838_v36, %v1837_v22 }
 0x72c   : > { %3948 = vmatpush3.bf16.msra.mxu1 %v3947_v27  ;;  %v1839_v27 = vld [vmem:[%s6163_s7 + $0x260] sm:$0x1] }
 0x72d   : > { %3949 = vmatprep.subr.bf16.mxu1 %v4349_v12 }
 0x730   : > { %3951 = vmatpush3.bf16.msra.mxu1 %v3950_v62  ;;  %v1842_v62 = vld [vmem:[%s6163_s7 + $0x278] sm:$0xff] }
 0x731   : > { %3467 = vmatprep.subr.mxu1 %v4343_v48  ;;  %v4001_v29 = vpack.c.bf16 %v1843_v28, %v1842_v62 }
 0x734   : > { %3468 = vmatpush3.msk.msra.mxu1 %vm1880_vm5, %v1804_v49  ;;  %v1844_v49 = vld [vmem:[%s6163_s7 + $0x288] sm:$0xff] }
 0x735   : > { %3470 = vmatmul.mubr.msk.f32.vlgmr.msra.gmra.mrb[6].mxu1 %vm1876_vm6, %v2263_v15  ;;  %3952 = vmatprep.subr.bf16.mxu1 %v4349_v12 }
 0x736   : > { %3954 = vmatpush3.bf16.msra.mxu1 %v3953_v40  ;;  %3486 = vmatprep.mubr.msk.f32.mxu1 %vm4351_vm0, %v4343_v48  ;;  %v1845_v40 = vld [vmem:[%s6163_s7 + $0x290] sm:$0xff] }
 0x737   : > { %3955 = vmatprep.subr.bf16.mxu1 %v4349_v12  ;;  %v4004_v15 = vpack.c.bf16 %v1845_v40, %v1844_v49 }
 0x73a   : > { %3957 = vmatpush3.bf16.msra.mxu1 %v3956_v5  ;;  %v1846_v5 = vld [vmem:[%s6163_s7 + $0x298] sm:$0x1] }
 0x73b   : > { %3958 = vmatprep.subr.bf16.mxu1 %v4349_v12 }
 0x73e   : > { %3960 = vmatpush3.bf16.msra.mxu1 %v3959_v57  ;;  %v1849_v57 = vld [vmem:[%s6163_s7 + $0x2b0] sm:$0xff] }
 0x73f   : > { %3484 = vmatprep.subr.mxu1 %v4343_v48  ;;  %v4010_v58 = vpack.c.bf16 %v1850_v43, %v1849_v57 }
 0x742   : > { %3485 = vmatpush3.msk.msra.mxu1 %vm1880_vm5, %v1811_v41  ;;  %v1851_v41 = vld [vmem:[%s6163_s7 + $0x2c0] sm:$0xff] }
 0x743   : > { %3487 = vmatmul.mubr.msk.f32.vlgmr.msra.gmra.mrb[6].mxu1 %vm1876_vm6, %v2340_v32  ;;  %3961 = vmatprep.subr.bf16.mxu1 %v4349_v12 }
 0x744   : > { %3963 = vmatpush3.bf16.msra.mxu1 %v3962_v11  ;;  %3503 = vmatprep.mubr.msk.f32.mxu1 %vm4351_vm0, %v4343_v48  ;;  %v1852_v11 = vld [vmem:[%s6163_s7 + $0x2c8] sm:$0xff] }
 0x745   : > { %3964 = vmatprep.subr.bf16.mxu1 %v4349_v12  ;;  %v4013_v32 = vpack.c.bf16 %v1852_v11, %v1851_v41 }
 0x748   : > { %3966 = vmatpush3.bf16.msra.mxu1 %v3965_v51  ;;  %v1853_v51 = vld [vmem:[%s6163_s7 + $0x2d0] sm:$0x1] }
 0x749   : > { %3967 = vmatprep.subr.bf16.mxu1 %v4349_v12 }
 0x74c   : > { %3969 = vmatpush3.bf16.msra.mxu1 %v3968_v14  ;;  %v1856_v14 = vld [vmem:[%s6163_s7 + $0x2e8] sm:$0xff] }
 0x74d   : > { %3501 = vmatprep.subr.mxu1 %v4343_v48  ;;  %v4019_v55 = vpack.c.bf16 %v1857_v52, %v1856_v14 }
 0x750   : > { %3502 = vmatpush3.msk.msra.mxu1 %vm1880_vm5, %v1818_v42  ;;  %v1858_v42 = vld [vmem:[%s6163_s7 + $0x2f8] sm:$0xff] }
 0x751   : > { %3504 = vmatmul.mubr.msk.f32.vlgmr.msra.gmra.mrb[6].mxu1 %vm1876_vm6, %v2417_v44  ;;  %3970 = vmatprep.subr.bf16.mxu1 %v4349_v12 }
 0x752   : > { %3972 = vmatpush3.bf16.msra.mxu1 %v3971_v30  ;;  %3520 = vmatprep.mubr.msk.f32.mxu1 %vm4351_vm0, %v4343_v48  ;;  %v1859_v30 = vld [vmem:[%s6163_s7 + $0x300] sm:$0xff] }
 0x753   : > { %3973 = vmatprep.subr.bf16.mxu1 %v4349_v12  ;;  %v4022_v44 = vpack.c.bf16 %v1859_v30, %v1858_v42 }
 0x756   : > { %3975 = vmatpush3.bf16.msra.mxu1 %v3974_v17  ;;  %v1860_v17 = vld [vmem:[%s6163_s7 + $0x308] sm:$0x1] }
 0x757   : > { %3976 = vmatprep.subr.bf16.mxu1 %v4349_v12 }
 0x75a   : > { %3978 = vmatpush3.bf16.msra.mxu1 %v3977_v3  ;;  %v1863_v3 = vld [vmem:[%s6163_s7 + $0x320] sm:$0xff] }
 0x75b   : > { %3518 = vmatprep.subr.mxu1 %v4343_v48 }
 0x75e   : > { %3519 = vmatpush3.msk.msra.mxu1 %vm1880_vm5, %v1825_v18  ;;  %v1864_v18 = vld [vmem:[%s6163_s7 + $0x328] sm:$0xff] }
 0x75f   : > { %3979 = vmatprep.subr.bf16.mxu1 %v4349_v12  ;;  %v4028_v19 = vpack.c.bf16 %v1864_v18, %v1863_v3 }
 0x775   : > { %v5905_v20 = vpop.f32.mrb[4].mxu0 }
 0x776   : > { %v1761_v21 = vpop.f32.mrb[5].mxu0  ;;  %3521 = vmatmul.mubr.msk.f32.vlgmr.msra.gmra.mrb[6].mxu1 %vm1876_vm6, %v5905_v20  ;;  %v2571_v26 = vrot.slane %v5905_v20, 1  ;;  %v2648_v25 = vrot.slane %v5905_v20, 2  ;;  %v2725_v56 = vrot.slane %v5905_v20, 3  ;;  %v2802_v13 = vrot.slane %v5905_v20, 4 }
 0x777   : > { %3981 = vmatpush3.bf16.msra.mxu1 %v3980_v10  ;;  %3537 = vmatprep.mubr.msk.f32.mxu1 %vm4351_vm0, %v4343_v48  ;;  %v2879_v39 = vrot.slane %v5905_v20, 5  ;;  %v1866_v10 = vld [vmem:[%s6163_s7 + $0x338] sm:$0xff]  ;;  %v1869_v21 = vld [vmem:[%s6163_s7 + $0x350] sm:$0xff]  ;;  %v2956_v50 = vrot.slane %v5905_v20, 6  ;;  %v3033_v33 = vrot.slane %v5905_v20, 7 }
 0x778   : > { %3982 = vmatprep.subr.bf16.mxu1 %v4349_v12  ;;  %v4031_v1 = vpack.c.bf16 %v1866_v10, %v1865_v63  ;;  %v4034_v23 = vpack.c.bf16 %v1869_v21, %v1868_v38 }
 0x77b   : > { %3984 = vmatpush3.bf16.msra.mxu1 %v3983_v24  ;;  %v1867_v24 = vld [vmem:[%s6163_s7 + $0x340] sm:$0x1] }
 0x77c   : > { %3985 = vmatprep.subr.bf16.mxu1 %v4349_v12 }
 0x77f   : > { %3987 = vmatpush3.bf16.msra.mxu1 %v3986_v0  ;;  %v1870_v0 = vld [vmem:[%s6163_s7 + $0x358] sm:$0xff] }
 0x780   : > { %3535 = vmatprep.subr.mxu1 %v4343_v48  ;;  %v4037_v9 = vpack.c.bf16 %v1871_v4, %v1870_v0 }
 0x783   : > { %3536 = vmatpush3.msk.msra.mxu1 %vm1880_vm5, %v1832_v46  ;;  %v1872_v46 = vld [vmem:[%s6163_s7 + $0x368] sm:$0xff] }
 0x784   : > { %3538 = vmatmul.mubr.msk.f32.vlgmr.msra.gmra.mrb[6].mxu1 %vm1876_vm6, %v2571_v26  ;;  %3988 = vmatprep.subr.bf16.mxu1 %v4349_v12 }
 0x785   : > { %3990 = vmatpush3.bf16.msra.mxu1 %v3989_v59  ;;  %3554 = vmatprep.mubr.msk.f32.mxu1 %vm4351_vm0, %v4343_v48  ;;  %v1873_v59 = vld [vmem:[%s6163_s7 + $0x370] sm:$0xff] }
 0x786   : > { %3991 = vmatprep.subr.bf16.mxu1 %v4349_v12  ;;  %v4040_v26 = vpack.c.bf16 %v1873_v59, %v1872_v46 }
 0x789   : > { %3993 = vmatpush3.bf16.msra.mxu1 %v3992_v54  ;;  %v1875_v54 = vld [vmem:[%s6164_s8] sm:$0x1] }
 0x78a   : > { %3994 = vmatprep.subr.bf16.mxu1 %v4349_v12 }
 0x78d   : > { %3996 = vmatpush3.bf16.msra.mxu1 %v3995_v45 }
 0x78e   : > { %3552 = vmatprep.subr.mxu1 %v4343_v48 }
 0x791   : > { %3553 = vmatpush3.msk.msra.mxu1 %vm1880_vm5, %v1839_v27 }
 0x792   : > { %3555 = vmatmul.mubr.msk.f32.vlgmr.msra.gmra.mrb[6].mxu1 %vm1876_vm6, %v2648_v25  ;;  %3997 = vmatprep.subr.bf16.mxu1 %v4349_v12 }
 0x793   : > { %3999 = vmatpush3.bf16.msra.mxu1 %v3998_v6  ;;  %3571 = vmatprep.mubr.msk.f32.mxu1 %vm4351_vm0, %v4343_v48 }
 0x794   : > { %4000 = vmatprep.subr.bf16.mxu1 %v4349_v12 }
 0x797   : > { %4002 = vmatpush3.bf16.msra.mxu1 %v4001_v29 }
 0x798   : > { %4003 = vmatprep.subr.bf16.mxu1 %v4349_v12 }
 0x79b   : > { %4005 = vmatpush3.bf16.msra.mxu1 %v4004_v15 }
 0x79c   : > { %3569 = vmatprep.subr.mxu1 %v4343_v48 }
 0x79f   : > { %3570 = vmatpush3.msk.msra.mxu1 %vm1880_vm5, %v1846_v5 }
 0x7a0   : > { %3572 = vmatmul.mubr.msk.f32.vlgmr.msra.gmra.mrb[6].mxu1 %vm1876_vm6, %v2725_v56  ;;  %4006 = vmatprep.subr.bf16.mxu1 %v4349_v12 }
 0x7a1   : > { %4008 = vmatpush3.bf16.msra.mxu1 %v4007_v8  ;;  %3588 = vmatprep.mubr.msk.f32.mxu1 %vm4351_vm0, %v4343_v48 }
 0x7a2   : > { %4009 = vmatprep.subr.bf16.mxu1 %v4349_v12 }
 0x7a5   : > { %4011 = vmatpush3.bf16.msra.mxu1 %v4010_v58 }
 0x7a6   : > { %4012 = vmatprep.subr.bf16.mxu1 %v4349_v12 }
 0x7a9   : > { %4014 = vmatpush3.bf16.msra.mxu1 %v4013_v32 }
 0x7aa   : > { %3586 = vmatprep.subr.mxu1 %v4343_v48 }
 0x7ad   : > { %3587 = vmatpush3.msk.msra.mxu1 %vm1880_vm5, %v1853_v51 }
 0x7ae   : > { %3589 = vmatmul.mubr.msk.f32.vlgmr.msra.gmra.mrb[6].mxu1 %vm1876_vm6, %v2802_v13  ;;  %4015 = vmatprep.subr.bf16.mxu1 %v4349_v12 }
 0x7af   : > { %4017 = vmatpush3.bf16.msra.mxu1 %v4016_v53  ;;  %3605 = vmatprep.mubr.msk.f32.mxu1 %vm4351_vm0, %v4343_v48 }
 0x7b0   : > { %4018 = vmatprep.subr.bf16.mxu1 %v4349_v12 }
 0x7b3   : > { %4020 = vmatpush3.bf16.msra.mxu1 %v4019_v55 }
 0x7b4   : > { %4021 = vmatprep.subr.bf16.mxu1 %v4349_v12 }
 0x7b7   : > { %4023 = vmatpush3.bf16.msra.mxu1 %v4022_v44 }
 0x7b8   : > { %3603 = vmatprep.subr.mxu1 %v4343_v48 }
 0x7bb   : > { %3604 = vmatpush3.msk.msra.mxu1 %vm1880_vm5, %v1860_v17 }
 0x7bc   : > { %3606 = vmatmul.mubr.msk.f32.vlgmr.msra.gmra.mrb[6].mxu1 %vm1876_vm6, %v2879_v39  ;;  %4024 = vmatprep.subr.bf16.mxu1 %v4349_v12 }
 0x7bd   : > { %4026 = vmatpush3.bf16.msra.mxu1 %v4025_v61  ;;  %3622 = vmatprep.mubr.msk.f32.mxu1 %vm4351_vm0, %v4343_v48 }
 0x7be   : > { %4027 = vmatprep.subr.bf16.mxu1 %v4349_v12 }
 0x7c1   : > { %4029 = vmatpush3.bf16.msra.mxu1 %v4028_v19 }
 0x7c2   : > { %4030 = vmatprep.subr.bf16.mxu1 %v4349_v12 }
 0x7c5   : > { %4032 = vmatpush3.bf16.msra.mxu1 %v4031_v1 }
 0x7c6   : > { %3620 = vmatprep.subr.mxu1 %v4343_v48 }
 0x7c9   : > { %3621 = vmatpush3.msk.msra.mxu1 %vm1880_vm5, %v1867_v24 }
 0x7ca   : > { %3623 = vmatmul.mubr.msk.f32.vlgmr.msra.gmra.mrb[6].mxu1 %vm1876_vm6, %v2956_v50  ;;  %4033 = vmatprep.subr.bf16.mxu1 %v4349_v12 }
 0x7cb   : > { %4035 = vmatpush3.bf16.msra.mxu1 %v4034_v23  ;;  %3639 = vmatprep.mubr.msk.f32.mxu1 %vm4351_vm0, %v4343_v48 }
 0x7cc   : > { %4036 = vmatprep.subr.bf16.mxu1 %v4349_v12 }
 0x7cf   : > { %4038 = vmatpush3.bf16.msra.mxu1 %v4037_v9 }
 0x7d0   : > { %4039 = vmatprep.subr.bf16.mxu1 %v4349_v12 }
 0x7d3   : > { %4041 = vmatpush3.bf16.msra.mxu1 %v4040_v26 }
 0x7d4   : > { %3637 = vmatprep.subr.mxu1 %v4343_v48 }
 0x7d7   : > { %3638 = vmatpush3.msk.msra.mxu1 %vm1880_vm5, %v1874_v2 }
 0x7d8   : > { %3640 = vmatmul.mubr.msk.f32.vlgmr.msra.gmra.mrb[6].mxu1 %vm1876_vm6, %v3033_v33 }
 0x8ab   : > { %v3105_v48 = vpop.f32.mrb[6].mxu1 }
 0x8ac   : > { %v4044_v12 = vadd.f32 %v3105_v48, %v1875_v54  ;;  %v3641_v22 = vpop.f32.mrb[7].mxu1 }
 0x8ae   : > { %3111 = vst.msk [vmem:[%s337_s27] sm:$0x1] %vm3110_vm7, %v4044_v12 }
 0x8af   : > { %4268 = shalt.err (!%p4265_p7)
}
 0x8b0   : > { %s4269_s22 = scalar_lea.hbm %s6114_s16, 16  ;;  %s4273_s27 = scalar_lea.hbm %s6165_s9, 32 }
 0x8b1   : > { %p4270_p8 = scmp.ne.s32.totalorder %s6114_s16, %s4269_s22  ;;  %p4274_p1 = scmp.lt.u32.totalorder %s6114_s16, %s6165_s9 }
 0x8b2   : > { %p4275_p0 = scmp.lt.u32.totalorder %s4273_s27, %s4269_s22  ;;  %p4277_p6 = scmp.lt.u32.totalorder %s4269_s22, %s6114_s16 }
 0x8b3   : > { %p4271_p11 = pnand %p4270_p8, %p6183_p9 }
 0x8b4   : > { %p4276_p5 = por %p4275_p0, %p4274_p1 }
 0x8b5   : > { %p4272_p13 = pneg %p4271_p11 }
 0x8b6   : > { %p4278_p10 = por %p4277_p6, %p4276_p5 }
 0x8b8   : > { %p4279_p12 = pnand %p4278_p10, %p4272_p13 }
 0x8ba   : > { %4282 = shalt.err (!%p4279_p12)
}
 0x8bb   : > { %4083 = dma.vmem_to_hbm [thread:$0]  (%p6183_p9), %s6116_s21, 16, %s6114_s16, %s3113_s25  }
 0x8bc PF: > { %p4095_p2 = scmp.ge.s32.totalorder %s4321_s12, 2  ;;  %s3137_s17 = sand.u32 1, %s4309_s30  }
 0x8bd   : > { %p6184_p3 = scmp.ne.s32.totalorder %s6174_s20, 0  ;;  %s3138_s13 = scalar_lea.sflag [#allocation4], %s3137_s17 }
 0x8bf   : > { %p4090_p4 = pnand %p4095_p2, %p6184_p3 }
 0x8c1   : > { %4304 = dma.done.wait (!%p4090_p4), %s3138_s13, 16  }
 0x8c2   : > { %4306 = vsyncadd (!%p4090_p4), %s3138_s13, 4294967280  ;;  %p20_p7 = scmp.ge.s32.totalorder %s4428_s15, 4   ;;  %s6185_s30 = smov %s4313_s10 }
 0x8c3   : > { %s6186_s10 = smov %s4317_s11  ;;  %s6187_s11 = smov %s4439_s18 }
 0x8c4   : > { %s6188_s12 = smov %s4428_s15  ;;  %22 = sbr.rel (!%p20_p7) target bundleno = 4 (0x4), region = 96 }
 0x8cb   :  { %3142 = vsyncpa [#allocation3], 1 }
 0x8cc   :  { %3144 = vsyncpa [#allocation3 + $0x1], 1 }
 0x8cd   :  { %3145 = vsyncpa [#allocation4], 1 }
 0x8ce   :  { %3147 = vsyncpa [#allocation4 + $0x1], 1 }

</bundles_post_ra>
